<compile_context>
chip_gen: v7x
topology: tpu7x:2x2x1
jax: 0.10.0
libtpu: 0.0.40
codegen_flags: <defaults>
</compile_context>

<pallas_src>
import jax
import jax.numpy as jnp
from jax.experimental import pallas as pl
from jax.experimental.pallas import tpu as pltpu

# --- small, module-consistent shapes -----------------------------------------
B, S, H = 2, 8, 32                  # batch, seq, hidden (768 in the real model)
NUM_HEADS = 4
HEAD_DIM = H // NUM_HEADS
FFN = 64                            # intermediate size
VOCAB, MAX_POS, TYPE_VOCAB = 100, 16, 2
NUM_LAYERS = 2
NUM_CLASSES = 42                    # matches the module default
CPAD = 128                          # lane-dense padded classifier width
LN_EPS = 1e-12
MASK_SCALE = 1e4                    # dtype-safe additive mask magnitude (HF uses -1e4)


def _ln(x, g, b):
    # LayerNorm kept in float32 (v5e VPU/EUP have no bf16 path).
    mu = jnp.mean(x, axis=-1, keepdims=True)
    var = jnp.mean((x - mu) ** 2, axis=-1, keepdims=True)
    return (x - mu) * jax.lax.rsqrt(var + LN_EPS) * g + b


# --- one fused kernel: embedding-LN -> L encoder layers -> classifier ---------
def fused_encoder_kernel(emb_ref, bias_ref, embln_ref,
                         wqkv_ref, wo_ref, w1_ref, w2_ref,
                         bwide_ref, vecs_ref, cls_ref,
                         logits_ref, h_ref):
    """grid = (NUM_LAYERS,); the (B*S, H) hidden state stays resident in VMEM."""
    layer = pl.program_id(0)

    # First layer step: embedding LayerNorm for the whole batch into scratch.
    @pl.when(layer == 0)
    def _():
        e = emb_ref[...].reshape(B * S, H)
        h_ref[...] = _ln(e, embln_ref[0:1, :], embln_ref[1:2, :])

    x = h_ref[...]                                           # (B*S, H) float32

    # --- fused QKV projection: one full-width bf16 MXU matmul.
    # wqkv: (H, 3H) with 1/sqrt(HD) pre-folded into the Q weight & bias columns.
    qkv = jnp.dot(x.astype(jnp.bfloat16), wqkv_ref[...],
                  preferred_element_type=jnp.float32) + bwide_ref[0:1, :]
    qkv = qkv.astype(jnp.bfloat16)                           # (B*S, 3H)

    # Additive key-pad mask, broadcast once per layer step.
    mbias = jnp.broadcast_to(bias_ref[...], (B, S, S))       # (B, S_q, S_k) f32

    # --- attention: per-head lane slices, batched over B (no in-kernel transposes).
    ctx_heads = []
    for n in range(NUM_HEADS):
        lo = n * HEAD_DIM
        q = qkv[:, lo:lo + HEAD_DIM].reshape(B, S, HEAD_DIM)
        k = qkv[:, H + lo:H + lo + HEAD_DIM].reshape(B, S, HEAD_DIM)
        v = qkv[:, 2 * H + lo:2 * H + lo + HEAD_DIM].reshape(B, S, HEAD_DIM)
        sc = jnp.einsum('bqd,bkd->bqk', q, k,
                        preferred_element_type=jnp.float32) + mbias
        sc = sc - jnp.max(sc, axis=-1, keepdims=True)
        p = jnp.exp(sc)
        p = p * pl.reciprocal(jnp.sum(p, axis=-1, keepdims=True), approx=True)
        ctx_heads.append(jnp.einsum('bqk,bkd->bqd', p.astype(jnp.bfloat16), v,
                                    preferred_element_type=jnp.float32))
    ctx = jnp.concatenate(ctx_heads, axis=-1).reshape(B * S, H)   # (B*S, H) f32

    # --- output projection: single full-width matmul over the concat'd heads.
    attn = jnp.dot(ctx.astype(jnp.bfloat16), wo_ref[...],
                   preferred_element_type=jnp.float32) + vecs_ref[0:1, :]   # + bo
    h1 = _ln(x + attn, vecs_ref[1:2, :], vecs_ref[2:3, :])

    # --- FFN: bf16 matmuls, f32 accumulation / elementwise.
    ff = jnp.dot(h1.astype(jnp.bfloat16), w1_ref[...],
                 preferred_element_type=jnp.float32) + bwide_ref[1:2, 0:FFN]
    # TODO(synk): ELECTRA uses exact (erf) GELU; tanh approximation used here.
    ff = jax.nn.gelu(ff, approximate=True)
    ff = jnp.dot(ff.astype(jnp.bfloat16), w2_ref[...],
                 preferred_element_type=jnp.float32) + vecs_ref[3:4, :]     # + b2
    out = _ln(h1 + ff, vecs_ref[4:5, :], vecs_ref[5:6, :])
    h_ref[...] = out

    # --- classifier on the CLS rows, lane-dense (CPAD = 128) output block.
    @pl.when(layer == pl.num_programs(0) - 1)
    def _():
        cls = jnp.concatenate([out[b * S:b * S + 1, :] for b in range(B)],
                              axis=0).astype(jnp.bfloat16)       # (B, H)
        w = cls_ref[0:H, :]                                       # (H, CPAD)
        bc = cls_ref[H:H + 1, :].astype(jnp.float32)              # (1, CPAD)
        logits_ref[...] = (jnp.dot(cls, w, preferred_element_type=jnp.float32)
                           + bc).astype(logits_ref.dtype)


# --- parameter init (deterministic, packed layouts) ----------------------------
def init_params(key):
    ks = jax.random.split(key, 12)

    def nrm(k, shape, std=0.02):
        return (std * jax.random.normal(k, shape)).astype(jnp.float32)

    L, HD = NUM_LAYERS, HEAD_DIM
    inv_sqrt_hd = 1.0 / jnp.sqrt(jnp.float32(HD))

    # Fold the 1/sqrt(HD) attention scale into the Q weight AND Q bias columns.
    wq = nrm(ks[0], (L, H, H)) * inv_sqrt_hd
    wk = nrm(ks[1], (L, H, H))
    wv = nrm(ks[2], (L, H, H))
    wqkv = jnp.concatenate([wq, wk, wv], axis=2)          # (L, H, 3H), [Q|K|V]

    wo = nrm(ks[3], (L, H, H))
    w1 = nrm(ks[4], (L, H, FFN))
    w2 = nrm(ks[5], (L, FFN, H))

    # Wide-bias slab (L, 2, 3H): row0 = qkv bias (Q cols pre-scaled), row1[:FFN] = b1.
    bqkv = jnp.zeros((L, 1, 3 * H), jnp.float32)
    bqkv = bqkv.at[:, :, :H].multiply(inv_sqrt_hd)        # keep scale-folding consistent
    b1 = jnp.zeros((L, 1, 3 * H), jnp.float32)            # first FFN lanes used
    bwide = jnp.concatenate([bqkv, b1], axis=1)

    ones = jnp.ones((L, 1, H), jnp.float32)
    zeros = jnp.zeros((L, 1, H), jnp.float32)
    # packed (L, 8, H) slab: rows = [bo, ln1_g, ln1_b, b2, ln2_g, ln2_b, pad, pad]
    vecs = jnp.concatenate([zeros, ones, zeros, zeros, ones, zeros, zeros, zeros],
                           axis=1)

    # Classifier slab (H+8, CPAD): rows 0..H-1 weight, row H bias, rest pad.
    cls = jnp.zeros((H + 8, CPAD), jnp.float32)
    cls = cls.at[:H, :NUM_CLASSES].set(nrm(ks[6], (H, NUM_CLASSES)))

    return {
        'word_emb': nrm(ks[7], (VOCAB, H)),
        'pos_emb': nrm(ks[8], (MAX_POS, H)),
        'type_emb': nrm(ks[9], (TYPE_VOCAB, H)),
        'emb_ln': jnp.concatenate([jnp.ones((1, H), jnp.float32),
                                   jnp.zeros((1, H), jnp.float32)], axis=0),
        'wqkv': wqkv.astype(jnp.bfloat16),
        'wo': wo.astype(jnp.bfloat16),
        'w1': w1.astype(jnp.bfloat16),
        'w2': w2.astype(jnp.bfloat16),
        'bwide': bwide,
        'vecs': vecs,
        'cls': cls.astype(jnp.bfloat16),
    }


# --- forward (mirrors KoElectraClassifier.forward) ------------------------------
@jax.jit
def ko_electra_classifier(params, input_ids, attention_mask, token_type_ids):
    # Embedding lookup (glue, plain JAX); everything else runs in one pallas_call.
    emb = (params['word_emb'][input_ids]
           + params['pos_emb'][jnp.arange(S)][None, :, :]
           + params['type_emb'][token_type_ids]).astype(jnp.float32)
    # Hoisted additive mask: 0 where attended, -1e4 where padded.
    bias = ((attention_mask.astype(jnp.float32) - 1.0) * MASK_SCALE).reshape(B, 1, S)

    out = pl.pallas_call(
        fused_encoder_kernel,
        out_shape=jax.ShapeDtypeStruct((B, CPAD), jnp.float32),
        grid_spec=pltpu.PrefetchScalarGridSpec(
            num_scalar_prefetch=0,
            grid=(NUM_LAYERS,),
            in_specs=[
                pl.BlockSpec((B, S, H), lambda l: (0, 0, 0)),            # emb
                pl.BlockSpec((B, 1, S), lambda l: (0, 0, 0)),            # mask bias
                pl.BlockSpec((2, H), lambda l: (0, 0)),                  # emb LN g/b
                pl.BlockSpec((None, H, 3 * H), lambda l: (l, 0, 0)),     # wqkv
                pl.BlockSpec((None, H, H), lambda l: (l, 0, 0)),         # wo
                pl.BlockSpec((None, H, FFN), lambda l: (l, 0, 0)),       # w1
                pl.BlockSpec((None, FFN, H), lambda l: (l, 0, 0)),       # w2
                pl.BlockSpec((None, 2, 3 * H), lambda l: (l, 0, 0)),     # wide biases
                pl.BlockSpec((None, 8, H), lambda l: (l, 0, 0)),         # packed vecs
                pl.BlockSpec((H + 8, CPAD), lambda l: (0, 0)),           # cls W+b slab
            ],
            out_specs=pl.BlockSpec((B, CPAD), lambda l: (0, 0)),
            scratch_shapes=[pltpu.VMEM((B * S, H), jnp.float32)],        # resident h
        ),
        compiler_params=pltpu.CompilerParams(
            dimension_semantics=("arbitrary",),
            vmem_limit_bytes=32 * 1024 * 1024,
        ),
    )(emb, bias, params['emb_ln'],
      params['wqkv'], params['wo'], params['w1'], params['w2'],
      params['bwide'], params['vecs'], params['cls'])

    # dr_rate is None -> dropout branch is not taken (matches module default).
    return out[:, :NUM_CLASSES]


if __name__ == "__main__":
    key = jax.random.PRNGKey(0)
    pk, ik = jax.random.split(key)
    params = init_params(pk)

    input_ids = jax.random.randint(ik, (B, S), 0, VOCAB, dtype=jnp.int32)
    # Same semantics as gen_attention_mask(token_ids, valid_length):
    valid_length = jnp.array([S, S - 3], dtype=jnp.int32)
    attention_mask = (jnp.arange(S)[None, :] < valid_length[:, None]).astype(jnp.float32)
    token_type_ids = jnp.zeros((B, S), dtype=jnp.int32)

    logits = ko_electra_classifier(params, input_ids, attention_mask, token_type_ids)
    jax.block_until_ready(logits)
    assert logits.shape == (B, NUM_CLASSES) and logits.dtype == jnp.float32
    print("KERNEL_OK")
</pallas_src>

<mosaic_0001>
module attributes {stable_mosaic.version = 11 : i64} {
  func.func @fused_encoder_kernel(%arg0: i32, %arg1: memref<2x8x32xf32, #tpu.memory_space<vmem>>, %arg2: memref<2x1x8xf32, #tpu.memory_space<vmem>>, %arg3: memref<2x32xf32, #tpu.memory_space<vmem>>, %arg4: memref<1x32x96xbf16, #tpu.memory_space<vmem>>, %arg5: memref<1x32x32xbf16, #tpu.memory_space<vmem>>, %arg6: memref<1x32x64xbf16, #tpu.memory_space<vmem>>, %arg7: memref<1x64x32xbf16, #tpu.memory_space<vmem>>, %arg8: memref<1x2x96xf32, #tpu.memory_space<vmem>>, %arg9: memref<1x8x32xf32, #tpu.memory_space<vmem>>, %arg10: memref<40x128xbf16, #tpu.memory_space<vmem>>, %arg11: memref<2x128xf32, #tpu.memory_space<vmem>>, %arg12: memref<16x32xf32, #tpu.memory_space<vmem>>) attributes {dimension_semantics = [#tpu.dimension_semantics<arbitrary>], iteration_bounds = array<i64: 2>, scalar_prefetch = 0 : i64, scratch_operands = 1 : i64, tpu.core_type = #tpu.core_type<tc>, window_params = [{pipeline_mode = #tpu.pipeline_mode<synchronous>, transform_indices = @transform_0, window_bounds = array<i64: 2, 8, 32>}, {pipeline_mode = #tpu.pipeline_mode<synchronous>, transform_indices = @transform_1, window_bounds = array<i64: 2, 1, 8>}, {pipeline_mode = #tpu.pipeline_mode<synchronous>, transform_indices = @transform_2, window_bounds = array<i64: 2, 32>}, {transform_indices = @transform_3, window_bounds = array<i64: 1, 32, 96>}, {transform_indices = @transform_4, window_bounds = array<i64: 1, 32, 32>}, {transform_indices = @transform_5, window_bounds = array<i64: 1, 32, 64>}, {transform_indices = @transform_6, window_bounds = array<i64: 1, 64, 32>}, {transform_indices = @transform_7, window_bounds = array<i64: 1, 2, 96>}, {transform_indices = @transform_8, window_bounds = array<i64: 1, 8, 32>}, {pipeline_mode = #tpu.pipeline_mode<synchronous>, transform_indices = @transform_9, window_bounds = array<i64: 40, 128>}, {pipeline_mode = #tpu.pipeline_mode<synchronous>, transform_indices = @transform_10, window_bounds = array<i64: 2, 128>}]} {
    %c0_i32 = arith.constant 0 : i32
    %0 = arith.cmpi eq, %arg0, %c0_i32 : i32
    %1 = arith.extui %0 : i1 to i32
    %c0_i32_0 = arith.constant 0 : i32
    %2 = arith.cmpi ne, %1, %c0_i32_0 : i32
    scf.if %2 {
      %c0_72 = arith.constant 0 : index
      %c0_73 = arith.constant 0 : index
      %c0_74 = arith.constant 0 : index
      %193 = vector.load %arg1[%c0_72, %c0_73, %c0_74] : memref<2x8x32xf32, #tpu.memory_space<vmem>>, vector<2x8x32xf32>
      %194 = vector.shape_cast %193 : vector<2x8x32xf32> to vector<16x32xf32>
      %c0_75 = arith.constant 0 : index
      %c0_76 = arith.constant 0 : index
      %195 = vector.load %arg3[%c0_75, %c0_76] : memref<2x32xf32, #tpu.memory_space<vmem>>, vector<1x32xf32>
      %c1_77 = arith.constant 1 : index
      %c0_78 = arith.constant 0 : index
      %196 = vector.load %arg3[%c1_77, %c0_78] : memref<2x32xf32, #tpu.memory_space<vmem>>, vector<1x32xf32>
      %cst_79 = arith.constant dense<0.000000e+00> : vector<16xf32>
      %197 = vector.multi_reduction <add>, %194, %cst_79 [1] : vector<16x32xf32> to vector<16xf32>
      %198 = vector.shape_cast %197 : vector<16xf32> to vector<16x1xf32>
      %cst_80 = arith.constant 3.200000e+01 : f32
      %199 = vector.broadcast %cst_80 : f32 to vector<16x1xf32>
      %200 = arith.divf %198, %199 : vector<16x1xf32>
      %201 = vector.broadcast %200 : vector<16x1xf32> to vector<16x32xf32>
      %202 = arith.subf %194, %201 : vector<16x32xf32>
      %203 = arith.mulf %202, %202 : vector<16x32xf32>
      %cst_81 = arith.constant dense<0.000000e+00> : vector<16xf32>
      %204 = vector.multi_reduction <add>, %203, %cst_81 [1] : vector<16x32xf32> to vector<16xf32>
      %205 = vector.shape_cast %204 : vector<16xf32> to vector<16x1xf32>
      %cst_82 = arith.constant 3.200000e+01 : f32
      %206 = vector.broadcast %cst_82 : f32 to vector<16x1xf32>
      %207 = arith.divf %205, %206 : vector<16x1xf32>
      %208 = vector.broadcast %200 : vector<16x1xf32> to vector<16x32xf32>
      %209 = arith.subf %194, %208 : vector<16x32xf32>
      %cst_83 = arith.constant 9.99999996E-13 : f32
      %210 = vector.broadcast %cst_83 : f32 to vector<16x1xf32>
      %211 = arith.addf %207, %210 : vector<16x1xf32>
      %212 = math.rsqrt %211 : vector<16x1xf32>
      %213 = vector.broadcast %212 : vector<16x1xf32> to vector<16x32xf32>
      %214 = arith.mulf %209, %213 : vector<16x32xf32>
      %215 = vector.broadcast %195 : vector<1x32xf32> to vector<16x32xf32>
      %216 = arith.mulf %214, %215 : vector<16x32xf32>
      %217 = vector.broadcast %196 : vector<1x32xf32> to vector<16x32xf32>
      %218 = arith.addf %216, %217 : vector<16x32xf32>
      %c0_84 = arith.constant 0 : index
      %c0_85 = arith.constant 0 : index
      %219 = vector.load %arg12[%c0_84, %c0_85] : memref<16x32xf32, #tpu.memory_space<vmem>>, vector<16x32xf32>
      tpu.vector_store %arg12[%c0_84, %c0_85], %218 {strides = array<i32>} : memref<16x32xf32, #tpu.memory_space<vmem>>, vector<16x32xf32>,
    } else {
    }
    %c0 = arith.constant 0 : index
    %c0_1 = arith.constant 0 : index
    %3 = vector.load %arg12[%c0, %c0_1] : memref<16x32xf32, #tpu.memory_space<vmem>>, vector<16x32xf32>
    %4 = arith.truncf %3 : vector<16x32xf32> to vector<16x32xbf16>
    %c0_2 = arith.constant 0 : index
    %c0_3 = arith.constant 0 : index
    %c0_4 = arith.constant 0 : index
    %5 = vector.load %arg4[%c0_2, %c0_3, %c0_4] : memref<1x32x96xbf16, #tpu.memory_space<vmem>>, vector<1x32x96xbf16>
    %6 = vector.shape_cast %5 : vector<1x32x96xbf16> to vector<32x96xbf16>
    %cst = arith.constant dense<0.000000e+00> : vector<16x96xf32>
    %7 = tpu.matmul %4, %6, %cst {dimension_numbers = #tpu.dot_dimension_numbers<[1], [0], [0], [1], [0, 0, 1, 1], [], []>} : vector<16x32xbf16>, vector<32x96xbf16>, vector<16x96xf32> -> vector<16x96xf32>
    %c0_5 = arith.constant 0 : index
    %c0_6 = arith.constant 0 : index
    %c0_7 = arith.constant 0 : index
    %8 = vector.load %arg8[%c0_5, %c0_6, %c0_7] : memref<1x2x96xf32, #tpu.memory_space<vmem>>, vector<1x1x96xf32>
    %9 = vector.shape_cast %8 : vector<1x1x96xf32> to vector<1x96xf32>
    %10 = vector.broadcast %9 : vector<1x96xf32> to vector<16x96xf32>
    %11 = arith.addf %7, %10 : vector<16x96xf32>
    %12 = arith.truncf %11 : vector<16x96xf32> to vector<16x96xbf16>
    %c0_8 = arith.constant 0 : index
    %c0_9 = arith.constant 0 : index
    %c0_10 = arith.constant 0 : index
    %13 = vector.load %arg2[%c0_8, %c0_9, %c0_10] : memref<2x1x8xf32, #tpu.memory_space<vmem>>, vector<2x1x8xf32>
    %14 = vector.shape_cast %13 : vector<2x1x8xf32> to vector<2x1x8xf32>
    %15 = vector.broadcast %14 : vector<2x1x8xf32> to vector<2x8x8xf32>
    %16 = vector.extract_strided_slice %12 {offsets = [0, 0], sizes = [16, 8], strides = [1, 1]} : vector<16x96xbf16> to vector<16x8xbf16>
    %17 = vector.shape_cast %16 : vector<16x8xbf16> to vector<2x8x8xbf16>
    %18 = vector.extract_strided_slice %12 {offsets = [0, 32], sizes = [16, 8], strides = [1, 1]} : vector<16x96xbf16> to vector<16x8xbf16>
    %19 = vector.shape_cast %18 : vector<16x8xbf16> to vector<2x8x8xbf16>
    %20 = vector.extract_strided_slice %12 {offsets = [0, 64], sizes = [16, 8], strides = [1, 1]} : vector<16x96xbf16> to vector<16x8xbf16>
    %21 = vector.shape_cast %20 : vector<16x8xbf16> to vector<2x8x8xbf16>
    "tpu.trace_start"() <{level = 10 : i32, message = "bqd,bkd->bqk"}> : () -> ()
    %cst_11 = arith.constant dense<0.000000e+00> : vector<2x8x8xf32>
    %22 = tpu.matmul %17, %19, %cst_11 {dimension_numbers = #tpu.dot_dimension_numbers<[2], [2], [1], [1], [0, 0, 0, 1, 1, 1], [0], [0]>} : vector<2x8x8xbf16>, vector<2x8x8xbf16>, vector<2x8x8xf32> -> vector<2x8x8xf32>
    "tpu.trace_stop"() : () -> ()
    %23 = arith.addf %22, %15 : vector<2x8x8xf32>
    %cst_12 = arith.constant dense<0xFF800000> : vector<2x8xf32>
    %24 = vector.multi_reduction <maximumf>, %23, %cst_12 [2] : vector<2x8x8xf32> to vector<2x8xf32>
    %25 = vector.shape_cast %24 : vector<2x8xf32> to vector<2x8x1xf32>
    %26 = vector.broadcast %25 : vector<2x8x1xf32> to vector<2x8x8xf32>
    %27 = arith.subf %23, %26 : vector<2x8x8xf32>
    %28 = math.exp %27 : vector<2x8x8xf32>
    %cst_13 = arith.constant dense<0.000000e+00> : vector<2x8xf32>
    %29 = vector.multi_reduction <add>, %28, %cst_13 [2] : vector<2x8x8xf32> to vector<2x8xf32>
    %30 = vector.shape_cast %29 : vector<2x8xf32> to vector<2x8x1xf32>
    %31 = tpu.reciprocal %30 {approx = true} : vector<2x8x1xf32> -> vector<2x8x1xf32>
    %32 = vector.broadcast %31 : vector<2x8x1xf32> to vector<2x8x8xf32>
    %33 = arith.mulf %28, %32 : vector<2x8x8xf32>
    %34 = arith.truncf %33 : vector<2x8x8xf32> to vector<2x8x8xbf16>
    "tpu.trace_start"() <{level = 10 : i32, message = "bqk,bkd->bqd"}> : () -> ()
    %cst_14 = arith.constant dense<0.000000e+00> : vector<2x8x8xf32>
    %35 = tpu.matmul %34, %21, %cst_14 {dimension_numbers = #tpu.dot_dimension_numbers<[2], [1], [1], [2], [0, 0, 0, 1, 1, 2], [0], [0]>} : vector<2x8x8xbf16>, vector<2x8x8xbf16>, vector<2x8x8xf32> -> vector<2x8x8xf32>
    "tpu.trace_stop"() : () -> ()
    %36 = vector.extract_strided_slice %12 {offsets = [0, 8], sizes = [16, 8], strides = [1, 1]} : vector<16x96xbf16> to vector<16x8xbf16>
    %37 = vector.shape_cast %36 : vector<16x8xbf16> to vector<2x8x8xbf16>
    %38 = vector.extract_strided_slice %12 {offsets = [0, 40], sizes = [16, 8], strides = [1, 1]} : vector<16x96xbf16> to vector<16x8xbf16>
    %39 = vector.shape_cast %38 : vector<16x8xbf16> to vector<2x8x8xbf16>
    %40 = vector.extract_strided_slice %12 {offsets = [0, 72], sizes = [16, 8], strides = [1, 1]} : vector<16x96xbf16> to vector<16x8xbf16>
    %41 = vector.shape_cast %40 : vector<16x8xbf16> to vector<2x8x8xbf16>
    "tpu.trace_start"() <{level = 10 : i32, message = "bqd,bkd->bqk"}> : () -> ()
    %cst_15 = arith.constant dense<0.000000e+00> : vector<2x8x8xf32>
    %42 = tpu.matmul %37, %39, %cst_15 {dimension_numbers = #tpu.dot_dimension_numbers<[2], [2], [1], [1], [0, 0, 0, 1, 1, 1], [0], [0]>} : vector<2x8x8xbf16>, vector<2x8x8xbf16>, vector<2x8x8xf32> -> vector<2x8x8xf32>
    "tpu.trace_stop"() : () -> ()
    %43 = arith.addf %42, %15 : vector<2x8x8xf32>
    %cst_16 = arith.constant dense<0xFF800000> : vector<2x8xf32>
    %44 = vector.multi_reduction <maximumf>, %43, %cst_16 [2] : vector<2x8x8xf32> to vector<2x8xf32>
    %45 = vector.shape_cast %44 : vector<2x8xf32> to vector<2x8x1xf32>
    %46 = vector.broadcast %45 : vector<2x8x1xf32> to vector<2x8x8xf32>
    %47 = arith.subf %43, %46 : vector<2x8x8xf32>
    %48 = math.exp %47 : vector<2x8x8xf32>
    %cst_17 = arith.constant dense<0.000000e+00> : vector<2x8xf32>
    %49 = vector.multi_reduction <add>, %48, %cst_17 [2] : vector<2x8x8xf32> to vector<2x8xf32>
    %50 = vector.shape_cast %49 : vector<2x8xf32> to vector<2x8x1xf32>
    %51 = tpu.reciprocal %50 {approx = true} : vector<2x8x1xf32> -> vector<2x8x1xf32>
    %52 = vector.broadcast %51 : vector<2x8x1xf32> to vector<2x8x8xf32>
    %53 = arith.mulf %48, %52 : vector<2x8x8xf32>
    %54 = arith.truncf %53 : vector<2x8x8xf32> to vector<2x8x8xbf16>
    "tpu.trace_start"() <{level = 10 : i32, message = "bqk,bkd->bqd"}> : () -> ()
    %cst_18 = arith.constant dense<0.000000e+00> : vector<2x8x8xf32>
    %55 = tpu.matmul %54, %41, %cst_18 {dimension_numbers = #tpu.dot_dimension_numbers<[2], [1], [1], [2], [0, 0, 0, 1, 1, 2], [0], [0]>} : vector<2x8x8xbf16>, vector<2x8x8xbf16>, vector<2x8x8xf32> -> vector<2x8x8xf32>
    "tpu.trace_stop"() : () -> ()
    %56 = vector.extract_strided_slice %12 {offsets = [0, 16], sizes = [16, 8], strides = [1, 1]} : vector<16x96xbf16> to vector<16x8xbf16>
    %57 = vector.shape_cast %56 : vector<16x8xbf16> to vector<2x8x8xbf16>
    %58 = vector.extract_strided_slice %12 {offsets = [0, 48], sizes = [16, 8], strides = [1, 1]} : vector<16x96xbf16> to vector<16x8xbf16>
    %59 = vector.shape_cast %58 : vector<16x8xbf16> to vector<2x8x8xbf16>
    %60 = vector.extract_strided_slice %12 {offsets = [0, 80], sizes = [16, 8], strides = [1, 1]} : vector<16x96xbf16> to vector<16x8xbf16>
    %61 = vector.shape_cast %60 : vector<16x8xbf16> to vector<2x8x8xbf16>
    "tpu.trace_start"() <{level = 10 : i32, message = "bqd,bkd->bqk"}> : () -> ()
    %cst_19 = arith.constant dense<0.000000e+00> : vector<2x8x8xf32>
    %62 = tpu.matmul %57, %59, %cst_19 {dimension_numbers = #tpu.dot_dimension_numbers<[2], [2], [1], [1], [0, 0, 0, 1, 1, 1], [0], [0]>} : vector<2x8x8xbf16>, vector<2x8x8xbf16>, vector<2x8x8xf32> -> vector<2x8x8xf32>
    "tpu.trace_stop"() : () -> ()
    %63 = arith.addf %62, %15 : vector<2x8x8xf32>
    %cst_20 = arith.constant dense<0xFF800000> : vector<2x8xf32>
    %64 = vector.multi_reduction <maximumf>, %63, %cst_20 [2] : vector<2x8x8xf32> to vector<2x8xf32>
    %65 = vector.shape_cast %64 : vector<2x8xf32> to vector<2x8x1xf32>
    %66 = vector.broadcast %65 : vector<2x8x1xf32> to vector<2x8x8xf32>
    %67 = arith.subf %63, %66 : vector<2x8x8xf32>
    %68 = math.exp %67 : vector<2x8x8xf32>
    %cst_21 = arith.constant dense<0.000000e+00> : vector<2x8xf32>
    %69 = vector.multi_reduction <add>, %68, %cst_21 [2] : vector<2x8x8xf32> to vector<2x8xf32>
    %70 = vector.shape_cast %69 : vector<2x8xf32> to vector<2x8x1xf32>
    %71 = tpu.reciprocal %70 {approx = true} : vector<2x8x1xf32> -> vector<2x8x1xf32>
    %72 = vector.broadcast %71 : vector<2x8x1xf32> to vector<2x8x8xf32>
    %73 = arith.mulf %68, %72 : vector<2x8x8xf32>
    %74 = arith.truncf %73 : vector<2x8x8xf32> to vector<2x8x8xbf16>
    "tpu.trace_start"() <{level = 10 : i32, message = "bqk,bkd->bqd"}> : () -> ()
    %cst_22 = arith.constant dense<0.000000e+00> : vector<2x8x8xf32>
    %75 = tpu.matmul %74, %61, %cst_22 {dimension_numbers = #tpu.dot_dimension_numbers<[2], [1], [1], [2], [0, 0, 0, 1, 1, 2], [0], [0]>} : vector<2x8x8xbf16>, vector<2x8x8xbf16>, vector<2x8x8xf32> -> vector<2x8x8xf32>
    "tpu.trace_stop"() : () -> ()
    %76 = vector.extract_strided_slice %12 {offsets = [0, 24], sizes = [16, 8], strides = [1, 1]} : vector<16x96xbf16> to vector<16x8xbf16>
    %77 = vector.shape_cast %76 : vector<16x8xbf16> to vector<2x8x8xbf16>
    %78 = vector.extract_strided_slice %12 {offsets = [0, 56], sizes = [16, 8], strides = [1, 1]} : vector<16x96xbf16> to vector<16x8xbf16>
    %79 = vector.shape_cast %78 : vector<16x8xbf16> to vector<2x8x8xbf16>
    %80 = vector.extract_strided_slice %12 {offsets = [0, 88], sizes = [16, 8], strides = [1, 1]} : vector<16x96xbf16> to vector<16x8xbf16>
    %81 = vector.shape_cast %80 : vector<16x8xbf16> to vector<2x8x8xbf16>
    "tpu.trace_start"() <{level = 10 : i32, message = "bqd,bkd->bqk"}> : () -> ()
    %cst_23 = arith.constant dense<0.000000e+00> : vector<2x8x8xf32>
    %82 = tpu.matmul %77, %79, %cst_23 {dimension_numbers = #tpu.dot_dimension_numbers<[2], [2], [1], [1], [0, 0, 0, 1, 1, 1], [0], [0]>} : vector<2x8x8xbf16>, vector<2x8x8xbf16>, vector<2x8x8xf32> -> vector<2x8x8xf32>
    "tpu.trace_stop"() : () -> ()
    %83 = arith.addf %82, %15 : vector<2x8x8xf32>
    %cst_24 = arith.constant dense<0xFF800000> : vector<2x8xf32>
    %84 = vector.multi_reduction <maximumf>, %83, %cst_24 [2] : vector<2x8x8xf32> to vector<2x8xf32>
    %85 = vector.shape_cast %84 : vector<2x8xf32> to vector<2x8x1xf32>
    %86 = vector.broadcast %85 : vector<2x8x1xf32> to vector<2x8x8xf32>
    %87 = arith.subf %83, %86 : vector<2x8x8xf32>
    %88 = math.exp %87 : vector<2x8x8xf32>
    %cst_25 = arith.constant dense<0.000000e+00> : vector<2x8xf32>
    %89 = vector.multi_reduction <add>, %88, %cst_25 [2] : vector<2x8x8xf32> to vector<2x8xf32>
    %90 = vector.shape_cast %89 : vector<2x8xf32> to vector<2x8x1xf32>
    %91 = tpu.reciprocal %90 {approx = true} : vector<2x8x1xf32> -> vector<2x8x1xf32>
    %92 = vector.broadcast %91 : vector<2x8x1xf32> to vector<2x8x8xf32>
    %93 = arith.mulf %88, %92 : vector<2x8x8xf32>
    %94 = arith.truncf %93 : vector<2x8x8xf32> to vector<2x8x8xbf16>
    "tpu.trace_start"() <{level = 10 : i32, message = "bqk,bkd->bqd"}> : () -> ()
    %cst_26 = arith.constant dense<0.000000e+00> : vector<2x8x8xf32>
    %95 = tpu.matmul %94, %81, %cst_26 {dimension_numbers = #tpu.dot_dimension_numbers<[2], [1], [1], [2], [0, 0, 0, 1, 1, 2], [0], [0]>} : vector<2x8x8xbf16>, vector<2x8x8xbf16>, vector<2x8x8xf32> -> vector<2x8x8xf32>
    "tpu.trace_stop"() : () -> ()
    %96 = tpu.concatenate %35, %55, %75, %95 in 2 : vector<2x8x8xf32>, vector<2x8x8xf32>, vector<2x8x8xf32>, vector<2x8x8xf32> -> vector<2x8x32xf32>
    %97 = vector.shape_cast %96 : vector<2x8x32xf32> to vector<16x32xf32>
    %98 = arith.truncf %97 : vector<16x32xf32> to vector<16x32xbf16>
    %c0_27 = arith.constant 0 : index
    %c0_28 = arith.constant 0 : index
    %c0_29 = arith.constant 0 : index
    %99 = vector.load %arg5[%c0_27, %c0_28, %c0_29] : memref<1x32x32xbf16, #tpu.memory_space<vmem>>, vector<1x32x32xbf16>
    %100 = vector.shape_cast %99 : vector<1x32x32xbf16> to vector<32x32xbf16>
    %cst_30 = arith.constant dense<0.000000e+00> : vector<16x32xf32>
    %101 = tpu.matmul %98, %100, %cst_30 {dimension_numbers = #tpu.dot_dimension_numbers<[1], [0], [0], [1], [0, 0, 1, 1], [], []>} : vector<16x32xbf16>, vector<32x32xbf16>, vector<16x32xf32> -> vector<16x32xf32>
    %c0_31 = arith.constant 0 : index
    %c0_32 = arith.constant 0 : index
    %c0_33 = arith.constant 0 : index
    %102 = vector.load %arg9[%c0_31, %c0_32, %c0_33] : memref<1x8x32xf32, #tpu.memory_space<vmem>>, vector<1x1x32xf32>
    %103 = vector.shape_cast %102 : vector<1x1x32xf32> to vector<1x32xf32>
    %104 = vector.broadcast %103 : vector<1x32xf32> to vector<16x32xf32>
    %105 = arith.addf %101, %104 : vector<16x32xf32>
    %106 = arith.addf %3, %105 : vector<16x32xf32>
    %c0_34 = arith.constant 0 : index
    %c1 = arith.constant 1 : index
    %c0_35 = arith.constant 0 : index
    %107 = vector.load %arg9[%c0_34, %c1, %c0_35] : memref<1x8x32xf32, #tpu.memory_space<vmem>>, vector<1x1x32xf32>
    %108 = vector.shape_cast %107 : vector<1x1x32xf32> to vector<1x32xf32>
    %c0_36 = arith.constant 0 : index
    %c2 = arith.constant 2 : index
    %c0_37 = arith.constant 0 : index
    %109 = vector.load %arg9[%c0_36, %c2, %c0_37] : memref<1x8x32xf32, #tpu.memory_space<vmem>>, vector<1x1x32xf32>
    %110 = vector.shape_cast %109 : vector<1x1x32xf32> to vector<1x32xf32>
    %cst_38 = arith.constant dense<0.000000e+00> : vector<16xf32>
    %111 = vector.multi_reduction <add>, %106, %cst_38 [1] : vector<16x32xf32> to vector<16xf32>
    %112 = vector.shape_cast %111 : vector<16xf32> to vector<16x1xf32>
    %cst_39 = arith.constant 3.200000e+01 : f32
    %113 = vector.broadcast %cst_39 : f32 to vector<16x1xf32>
    %114 = arith.divf %112, %113 : vector<16x1xf32>
    %115 = vector.broadcast %114 : vector<16x1xf32> to vector<16x32xf32>
    %116 = arith.subf %106, %115 : vector<16x32xf32>
    %117 = arith.mulf %116, %116 : vector<16x32xf32>
    %cst_40 = arith.constant dense<0.000000e+00> : vector<16xf32>
    %118 = vector.multi_reduction <add>, %117, %cst_40 [1] : vector<16x32xf32> to vector<16xf32>
    %119 = vector.shape_cast %118 : vector<16xf32> to vector<16x1xf32>
    %cst_41 = arith.constant 3.200000e+01 : f32
    %120 = vector.broadcast %cst_41 : f32 to vector<16x1xf32>
    %121 = arith.divf %119, %120 : vector<16x1xf32>
    %122 = vector.broadcast %114 : vector<16x1xf32> to vector<16x32xf32>
    %123 = arith.subf %106, %122 : vector<16x32xf32>
    %cst_42 = arith.constant 9.99999996E-13 : f32
    %124 = vector.broadcast %cst_42 : f32 to vector<16x1xf32>
    %125 = arith.addf %121, %124 : vector<16x1xf32>
    %126 = math.rsqrt %125 : vector<16x1xf32>
    %127 = vector.broadcast %126 : vector<16x1xf32> to vector<16x32xf32>
    %128 = arith.mulf %123, %127 : vector<16x32xf32>
    %129 = vector.broadcast %108 : vector<1x32xf32> to vector<16x32xf32>
    %130 = arith.mulf %128, %129 : vector<16x32xf32>
    %131 = vector.broadcast %110 : vector<1x32xf32> to vector<16x32xf32>
    %132 = arith.addf %130, %131 : vector<16x32xf32>
    %133 = arith.truncf %132 : vector<16x32xf32> to vector<16x32xbf16>
    %c0_43 = arith.constant 0 : index
    %c0_44 = arith.constant 0 : index
    %c0_45 = arith.constant 0 : index
    %134 = vector.load %arg6[%c0_43, %c0_44, %c0_45] : memref<1x32x64xbf16, #tpu.memory_space<vmem>>, vector<1x32x64xbf16>
    %135 = vector.shape_cast %134 : vector<1x32x64xbf16> to vector<32x64xbf16>
    %cst_46 = arith.constant dense<0.000000e+00> : vector<16x64xf32>
    %136 = tpu.matmul %133, %135, %cst_46 {dimension_numbers = #tpu.dot_dimension_numbers<[1], [0], [0], [1], [0, 0, 1, 1], [], []>} : vector<16x32xbf16>, vector<32x64xbf16>, vector<16x64xf32> -> vector<16x64xf32>
    %c0_47 = arith.constant 0 : index
    %c1_48 = arith.constant 1 : index
    %c0_49 = arith.constant 0 : index
    %137 = vector.load %arg8[%c0_47, %c1_48, %c0_49] : memref<1x2x96xf32, #tpu.memory_space<vmem>>, vector<1x1x64xf32>
    %138 = vector.shape_cast %137 : vector<1x1x64xf32> to vector<1x64xf32>
    %139 = vector.broadcast %138 : vector<1x64xf32> to vector<16x64xf32>
    %140 = arith.addf %136, %139 : vector<16x64xf32>
    %141 = arith.mulf %140, %140 : vector<16x64xf32>
    %142 = arith.mulf %140, %141 : vector<16x64xf32>
    %cst_50 = arith.constant 4.471500e-02 : f32
    %143 = vector.broadcast %cst_50 : f32 to vector<16x64xf32>
    %144 = arith.mulf %143, %142 : vector<16x64xf32>
    %145 = arith.addf %140, %144 : vector<16x64xf32>
    %cst_51 = arith.constant 0.797884583 : f32
    %146 = vector.broadcast %cst_51 : f32 to vector<16x64xf32>
    %147 = arith.mulf %146, %145 : vector<16x64xf32>
    %148 = math.tanh %147 : vector<16x64xf32>
    %cst_52 = arith.constant 1.000000e+00 : f32
    %149 = vector.broadcast %cst_52 : f32 to vector<16x64xf32>
    %150 = arith.addf %149, %148 : vector<16x64xf32>
    %cst_53 = arith.constant 5.000000e-01 : f32
    %151 = vector.broadcast %cst_53 : f32 to vector<16x64xf32>
    %152 = arith.mulf %151, %150 : vector<16x64xf32>
    %153 = arith.mulf %140, %152 : vector<16x64xf32>
    %154 = arith.truncf %153 : vector<16x64xf32> to vector<16x64xbf16>
    %c0_54 = arith.constant 0 : index
    %c0_55 = arith.constant 0 : index
    %c0_56 = arith.constant 0 : index
    %155 = vector.load %arg7[%c0_54, %c0_55, %c0_56] : memref<1x64x32xbf16, #tpu.memory_space<vmem>>, vector<1x64x32xbf16>
    %156 = vector.shape_cast %155 : vector<1x64x32xbf16> to vector<64x32xbf16>
    %cst_57 = arith.constant dense<0.000000e+00> : vector<16x32xf32>
    %157 = tpu.matmul %154, %156, %cst_57 {dimension_numbers = #tpu.dot_dimension_numbers<[1], [0], [0], [1], [0, 0, 1, 1], [], []>} : vector<16x64xbf16>, vector<64x32xbf16>, vector<16x32xf32> -> vector<16x32xf32>
    %c0_58 = arith.constant 0 : index
    %c3 = arith.constant 3 : index
    %c0_59 = arith.constant 0 : index
    %158 = vector.load %arg9[%c0_58, %c3, %c0_59] : memref<1x8x32xf32, #tpu.memory_space<vmem>>, vector<1x1x32xf32>
    %159 = vector.shape_cast %158 : vector<1x1x32xf32> to vector<1x32xf32>
    %160 = vector.broadcast %159 : vector<1x32xf32> to vector<16x32xf32>
    %161 = arith.addf %157, %160 : vector<16x32xf32>
    %162 = arith.addf %132, %161 : vector<16x32xf32>
    %c0_60 = arith.constant 0 : index
    %c4 = arith.constant 4 : index
    %c0_61 = arith.constant 0 : index
    %163 = vector.load %arg9[%c0_60, %c4, %c0_61] : memref<1x8x32xf32, #tpu.memory_space<vmem>>, vector<1x1x32xf32>
    %164 = vector.shape_cast %163 : vector<1x1x32xf32> to vector<1x32xf32>
    %c0_62 = arith.constant 0 : index
    %c5 = arith.constant 5 : index
    %c0_63 = arith.constant 0 : index
    %165 = vector.load %arg9[%c0_62, %c5, %c0_63] : memref<1x8x32xf32, #tpu.memory_space<vmem>>, vector<1x1x32xf32>
    %166 = vector.shape_cast %165 : vector<1x1x32xf32> to vector<1x32xf32>
    %cst_64 = arith.constant dense<0.000000e+00> : vector<16xf32>
    %167 = vector.multi_reduction <add>, %162, %cst_64 [1] : vector<16x32xf32> to vector<16xf32>
    %168 = vector.shape_cast %167 : vector<16xf32> to vector<16x1xf32>
    %cst_65 = arith.constant 3.200000e+01 : f32
    %169 = vector.broadcast %cst_65 : f32 to vector<16x1xf32>
    %170 = arith.divf %168, %169 : vector<16x1xf32>
    %171 = vector.broadcast %170 : vector<16x1xf32> to vector<16x32xf32>
    %172 = arith.subf %162, %171 : vector<16x32xf32>
    %173 = arith.mulf %172, %172 : vector<16x32xf32>
    %cst_66 = arith.constant dense<0.000000e+00> : vector<16xf32>
    %174 = vector.multi_reduction <add>, %173, %cst_66 [1] : vector<16x32xf32> to vector<16xf32>
    %175 = vector.shape_cast %174 : vector<16xf32> to vector<16x1xf32>
    %cst_67 = arith.constant 3.200000e+01 : f32
    %176 = vector.broadcast %cst_67 : f32 to vector<16x1xf32>
    %177 = arith.divf %175, %176 : vector<16x1xf32>
    %178 = vector.broadcast %170 : vector<16x1xf32> to vector<16x32xf32>
    %179 = arith.subf %162, %178 : vector<16x32xf32>
    %cst_68 = arith.constant 9.99999996E-13 : f32
    %180 = vector.broadcast %cst_68 : f32 to vector<16x1xf32>
    %181 = arith.addf %177, %180 : vector<16x1xf32>
    %182 = math.rsqrt %181 : vector<16x1xf32>
    %183 = vector.broadcast %182 : vector<16x1xf32> to vector<16x32xf32>
    %184 = arith.mulf %179, %183 : vector<16x32xf32>
    %185 = vector.broadcast %164 : vector<1x32xf32> to vector<16x32xf32>
    %186 = arith.mulf %184, %185 : vector<16x32xf32>
    %187 = vector.broadcast %166 : vector<1x32xf32> to vector<16x32xf32>
    %188 = arith.addf %186, %187 : vector<16x32xf32>
    %c0_69 = arith.constant 0 : index
    %c0_70 = arith.constant 0 : index
    %189 = vector.load %arg12[%c0_69, %c0_70] : memref<16x32xf32, #tpu.memory_space<vmem>>, vector<16x32xf32>
    tpu.vector_store %arg12[%c0_69, %c0_70], %188 {strides = array<i32>} : memref<16x32xf32, #tpu.memory_space<vmem>>, vector<16x32xf32>,
    %c1_i32 = arith.constant 1 : i32
    %190 = arith.cmpi eq, %arg0, %c1_i32 : i32
    %191 = arith.extui %190 : i1 to i32
    %c0_i32_71 = arith.constant 0 : i32
    %192 = arith.cmpi ne, %191, %c0_i32_71 : i32
    scf.if %192 {
      %193 = vector.extract_strided_slice %188 {offsets = [0, 0], sizes = [1, 32], strides = [1, 1]} : vector<16x32xf32> to vector<1x32xf32>
      %194 = vector.extract_strided_slice %188 {offsets = [8, 0], sizes = [1, 32], strides = [1, 1]} : vector<16x32xf32> to vector<1x32xf32>
      %195 = tpu.concatenate %193, %194 in 0 : vector<1x32xf32>, vector<1x32xf32> -> vector<2x32xf32>
      %196 = arith.truncf %195 : vector<2x32xf32> to vector<2x32xbf16>
      %c0_72 = arith.constant 0 : index
      %c0_73 = arith.constant 0 : index
      %197 = vector.load %arg10[%c0_72, %c0_73] : memref<40x128xbf16, #tpu.memory_space<vmem>>, vector<32x128xbf16>
      %c32 = arith.constant 32 : index
      %c0_74 = arith.constant 0 : index
      %198 = vector.load %arg10[%c32, %c0_74] : memref<40x128xbf16, #tpu.memory_space<vmem>>, vector<1x128xbf16>
      %199 = arith.extf %198 : vector<1x128xbf16> to vector<1x128xf32>
      %cst_75 = arith.constant dense<0.000000e+00> : vector<2x128xf32>
      %200 = tpu.matmul %196, %197, %cst_75 {dimension_numbers = #tpu.dot_dimension_numbers<[1], [0], [0], [1], [0, 0, 1, 1], [], []>} : vector<2x32xbf16>, vector<32x128xbf16>, vector<2x128xf32> -> vector<2x128xf32>
      %201 = vector.broadcast %199 : vector<1x128xf32> to vector<2x128xf32>
      %202 = arith.addf %200, %201 : vector<2x128xf32>
      %c0_76 = arith.constant 0 : index
      %c0_77 = arith.constant 0 : index
      %203 = vector.load %arg11[%c0_76, %c0_77] : memref<2x128xf32, #tpu.memory_space<vmem>>, vector<2x128xf32>
      tpu.vector_store %arg11[%c0_76, %c0_77], %202 {strides = array<i32>} : memref<2x128xf32, #tpu.memory_space<vmem>>, vector<2x128xf32>,
    } else {
    }
    return
  }
  func.func @transform_0(%arg0: i32) -> (i32, i32, i32) {
    %c0_i32 = arith.constant 0 : i32
    %c0_i32_0 = arith.constant 0 : i32
    %c0_i32_1 = arith.constant 0 : i32
    %c0_i32_2 = arith.constant 0 : i32
    return %c0_i32, %c0_i32_0, %c0_i32_1 : i32, i32, i32
  }
  func.func @transform_1(%arg0: i32) -> (i32, i32, i32) {
    %c0_i32 = arith.constant 0 : i32
    %c0_i32_0 = arith.constant 0 : i32
    %c0_i32_1 = arith.constant 0 : i32
    %c0_i32_2 = arith.constant 0 : i32
    return %c0_i32, %c0_i32_0, %c0_i32_1 : i32, i32, i32
  }
  func.func @transform_2(%arg0: i32) -> (i32, i32) {
    %c0_i32 = arith.constant 0 : i32
    %c0_i32_0 = arith.constant 0 : i32
    %c0_i32_1 = arith.constant 0 : i32
    return %c0_i32, %c0_i32_0 : i32, i32
  }
  func.func @transform_3(%arg0: i32) -> (i32, i32, i32) {
    %c0_i32 = arith.constant 0 : i32
    %c0_i32_0 = arith.constant 0 : i32
    %c0_i32_1 = arith.constant 0 : i32
    return %arg0, %c0_i32, %c0_i32_0 : i32, i32, i32
  }
  func.func @transform_4(%arg0: i32) -> (i32, i32, i32) {
    %c0_i32 = arith.constant 0 : i32
    %c0_i32_0 = arith.constant 0 : i32
    %c0_i32_1 = arith.constant 0 : i32
    return %arg0, %c0_i32, %c0_i32_0 : i32, i32, i32
  }
  func.func @transform_5(%arg0: i32) -> (i32, i32, i32) {
    %c0_i32 = arith.constant 0 : i32
    %c0_i32_0 = arith.constant 0 : i32
    %c0_i32_1 = arith.constant 0 : i32
    return %arg0, %c0_i32, %c0_i32_0 : i32, i32, i32
  }
  func.func @transform_6(%arg0: i32) -> (i32, i32, i32) {
    %c0_i32 = arith.constant 0 : i32
    %c0_i32_0 = arith.constant 0 : i32
    %c0_i32_1 = arith.constant 0 : i32
    return %arg0, %c0_i32, %c0_i32_0 : i32, i32, i32
  }
  func.func @transform_7(%arg0: i32) -> (i32, i32, i32) {
    %c0_i32 = arith.constant 0 : i32
    %c0_i32_0 = arith.constant 0 : i32
    %c0_i32_1 = arith.constant 0 : i32
    return %arg0, %c0_i32, %c0_i32_0 : i32, i32, i32
  }
  func.func @transform_8(%arg0: i32) -> (i32, i32, i32) {
    %c0_i32 = arith.constant 0 : i32
    %c0_i32_0 = arith.constant 0 : i32
    %c0_i32_1 = arith.constant 0 : i32
    return %arg0, %c0_i32, %c0_i32_0 : i32, i32, i32
  }
  func.func @transform_9(%arg0: i32) -> (i32, i32) {
    %c0_i32 = arith.constant 0 : i32
    %c0_i32_0 = arith.constant 0 : i32
    %c0_i32_1 = arith.constant 0 : i32
    return %c0_i32, %c0_i32_0 : i32, i32
  }
  func.func @transform_10(%arg0: i32) -> (i32, i32) {
    %c0_i32 = arith.constant 0 : i32
    %c0_i32_0 = arith.constant 0 : i32
    %c0_i32_1 = arith.constant 0 : i32
    return %c0_i32, %c0_i32_0 : i32, i32
  }
}

</mosaic_0001>

<bundles_post_ra>
// kernel: ko_electra_classifier.1
= control target key start
LH: loop header
LB: loop body
LE: loop exit
PB: predicated region body
PF: predicated region fallthrough
CT: control target
= control target key end

     0   :  { %s2788_s0 = inlined_call_operand.vmem [shape: f32[2,8,32], index: 0, kind: input, shape index: {}]   ;;  %s2789_s1 = inlined_call_operand.vmem [shape: f32[2,1,8], index: 1, kind: input, shape index: {}]   ;;  %s2790_s2 = inlined_call_operand.vmem [shape: f32[2,32], index: 2, kind: input, shape index: {}]   ;;  %s2791_s3 = inlined_call_operand.vmem [shape: bf16[2,32,96], index: 3, kind: input, shape index: {}]   ;;  %s2792_s4 = inlined_call_operand.vmem [shape: bf16[2,32,32], index: 4, kind: input, shape index: {}]   ;;  %s2793_s5 = inlined_call_operand.vmem [shape: bf16[2,32,64], index: 5, kind: input, shape index: {}]   ;;  %s2794_s6 = inlined_call_operand.vmem [shape: bf16[2,64,32], index: 6, kind: input, shape index: {}]   ;;  %s2795_s7 = inlined_call_operand.vmem [shape: f32[2,2,96], index: 7, kind: input, shape index: {}]   ;;  %s2796_s8 = inlined_call_operand.vmem [shape: f32[2,8,32], index: 8, kind: input, shape index: {}]   ;;  %s2797_s9 = inlined_call_operand.vmem [shape: bf16[40,128], index: 9, kind: input, shape index: {}]   ;;  %s2798_s10 = inlined_call_operand.hbm [shape: f32[2,128], index: 10, kind: output, shape index: {}]  }
   0x1   :  { %2799 = sst [smem:[#allocation6_spill]] %s2791_s3 }
   0x2   :  { %15 = vsyncpa [#allocation4], 0  ;;  %s2474_s13 = smov 0  }
   0x3 LB: > { %s2480_s14 = sadd.s32 4294967295, %s2398_s13   ;;  %p1995_p0 = scmp.ge.s32.totalorder %s2398_s13, 1  ;;  %s2398_s13 = sphi %s2474_s13, %s21_s13  }
   0x4   : > { %p356_p1 = scmp.lt.s32.totalorder %s2398_s13, 3 }
   0x6   : > { %p357_p2 = pnand %p1995_p0, %p356_p1 }
   0x7   : > { %p412_p3 = scmp.lt.s32.totalorder (!%p357_p2), %s2480_s14, 1  ;;  %s2800_s3 = sld [smem:[#allocation6_spill]] (!%p357_p2) }
   0x8   : > { %360 = sbr.rel (%p357_p2) target bundleno = 4719 (0x126f), region = 60  ;;  %p2006_p4 = scmp.ne.s32.totalorder (!%p357_p2), %s2480_s14, 0 }
   0xf   : > { %s413_s15 = scalar_select %p412_p3, %s2480_s14, 1 }
  0x10   : > { %444 = sbr.rel (%p2006_p4) target bundleno = 335 (0x14f), region = 64  ;;  %v445_v0 = vld [vmem:[%s2788_s0] sm:$0xff] (!%p2006_p4)  ;;  %vm449_vm0 = vcmask (!%p2006_p4), 261120   ;;  %v446_v1 = vld [vmem:[%s2788_s0 + $0x8] sm:$0xff] (!%p2006_p4) }
  0x11   : > { %s2059_s16 = sshll.u32 %s413_s15, 4  ;;  %s2062_s17 = sshll.u32 %s413_s15, 5  ;;  %v450_v2 = vsel (!%p2006_p4), %vm449_vm0, %v445_v0, 0.0  ;;  %v453_v3 = vsel (!%p2006_p4), %vm449_vm0, %v446_v1, 0.0  ;;  %v2007_v21 = vld [vmem:[%s2790_s2] ss:$0 sm:$0xff] (!%p2006_p4) }
  0x12   : > { %s2489_s20 = scalar_lea.vmem %s2800_s3, %s2059_s16  ;;  %s2494_s23 = scalar_lea.vmem %s2792_s4, %s2059_s16  ;;  %451 = vadd.xlane.f32.xlu0 (!%p2006_p4), %v450_v2  ;;  %v2008_v23 = vld [vmem:[%s2790_s2 + $0x1] ss:$0 sm:$0xff] (!%p2006_p4) }
  0x13   : > { %s2499_s26 = scalar_lea.vmem %s2793_s5, %s2059_s16  ;;  %s2504_s29 = scalar_lea.vmem %s2794_s6, %s2062_s17 }
  0x14   : > { %s2004_s30 = sshll.u32 %s413_s15, 1  ;;  %s2005_s11 = sshll.u32 %s413_s15, 3 }
  0x15   : > { %s2509_s19 = scalar_lea.vmem %s2795_s7, %s2004_s30  ;;  %s2514_s3 = scalar_lea.vmem %s2796_s8, %s2005_s11 }
  0x16   : > { %454 = vadd.xlane.f32.xlu0 (!%p2006_p4), %v453_v3 }
  0x9f   : > { %v452_v4 = vpop.xlane.xlu0 %451 }
  0xa0   : > { %v457_v5 = vmul.f32 0.03125, %v452_v4 }
  0xa2   : > { %v459_v6 = vsub.f32 %v445_v0, %v457_v5 }
  0xa3   : > { %v455_v7 = vpop.xlane.xlu0 %454 }
  0xa4   : > { %v458_v8 = vmul.f32 0.03125, %v455_v7  ;;  %v461_v9 = vmul.f32 %v459_v6, %v459_v6 }
  0xa6   : > { %v460_v10 = vsub.f32 %v446_v1, %v458_v8  ;;  %v463_v11 = vsel %vm449_vm0, %v461_v9, 0.0 }
  0xa7   : > { %464 = vadd.xlane.f32.xlu1 %v463_v11 }
  0xa8   : > { %v462_v12 = vmul.f32 %v460_v10, %v460_v10 }
  0xaa   : > { %v466_v13 = vsel %vm449_vm0, %v462_v12, 0.0 }
  0xab   : > { %467 = vadd.xlane.f32.xlu1 %v466_v13 }
 0x134   : > { %v465_v14 = vpop.xlane.xlu1 %464 }
 0x135   : > { %v469_v15 = vmul.f32 0.03125, %v465_v14 }
 0x137   : > { %v471_v16 = vadd.f32 1e-12, %v469_v15 }
 0x138   : > { %v468_v17 = vpop.xlane.xlu1 %467 }
 0x139   : > { %2287 = vrsqrt.f32 %v471_v16  ;;  %v470_v18 = vmul.f32 0.03125, %v468_v17 }
 0x13b   : > { %v472_v19 = vadd.f32 1e-12, %v470_v18 }
 0x13d   : > { %2289 = vrsqrt.f32 %v472_v19 }
 0x143   : > { %v2288_v20 = vpop.eup %2287 }
 0x144   : > { %v475_v22 = vmul.f32 %v2288_v20, %v459_v6 }
 0x146   : > { %v481_v24 = vmul.f32 %v2007_v21, %v475_v22 }
 0x147   : > { %v2290_v25 = vpop.eup %2289 }
 0x148   : > { %v487_v26 = vadd.f32 %v2008_v23, %v481_v24  ;;  %v476_v27 = vmul.f32 %v2290_v25, %v460_v10 }
 0x14a   : > { %489 = vst.msk [vmem:[#allocation2] sm:$0xff] %vm449_vm0, %v487_v26  ;;  %v482_v28 = vmul.f32 %v2007_v21, %v476_v27 }
 0x14c   : > { %v488_v29 = vadd.f32 %v2008_v23, %v482_v28 }
 0x14e   : > { %490 = vst.msk [vmem:[#allocation2 + $0x8] sm:$0xff] %vm449_vm0, %v488_v29 }
 0x14f PF: > { %v2306_v30 = vld [vmem:[%s2489_s20] sm:$0xff]   ;;  %v2400_v31 = vmov 0.0   ;;  %v2307_v32 = vld [vmem:[%s2489_s20 + $0x8] sm:$0xff]   ;;  %vm2401_vm1 = vmmov 0   ;;  %vm515_vm2 = vcmask 261120   ;;  %s2402_s20 = smov 96  }
 0x150   : > { %2114 = vmatprep.subr.bf16.mxu0 %v2400_v31  ;;  %2122 = vmatprep.subr.bf16.mxu1 %v2400_v31  ;;  %v2009_v36 = vld [vmem:[%s2509_s19] ss:$0 sm:$0xff]  ;;  %vm582_vm3 = vcmask 64512   ;;  %v2582_v54 = vld [vmem:[%s2789_s1 + $0x1] ss:$0 sm:$0xff]  ;;  %s2403_s22 = smov 64  }
 0x151   : > { %2115 = vmatpush3.bf16.msra.mxu0 %v2306_v30  ;;  %2118 = vmatprep.mubr.msk.bf16.mxu0 %vm2401_vm1, %v2400_v31  ;;  %v2541_v33 = vld [vmem:[#allocation2] sm:$0xff]  ;;  %s2404_s16 = smov 88   ;;  %vm706_vm4 = vcmask 1043456   ;;  %s2405_s24 = smov 120   ;;  %vm1484_vm5 = vcmask 130048   ;;  %vm1487_vm6 = vcmask 195584  }
 0x152   : > { %2116 = vmatprep.subr.bf16.mxu0 %v2400_v31  ;;  %2124 = vmatprep.mubr.msk.bf16.mxu1 %vm2401_vm1, %v2400_v31  ;;  %v2576_v49 = vld [vmem:[%s2789_s1] ss:$0 sm:$0xff]  ;;  %s2406_s17 = smov 56   ;;  %s2407_s15 = smov 80   ;;  %vm1721_vm7 = vcmask 523264  }
 0x153   : > { %s2408_s25 = smov 112   ;;  %s2409_s27 = smov 48  }
 0x154   : > { %s2410_s28 = smov 72   ;;  %s2411_s30 = smov 104  }
 0x155   : > { %v2543_v34 = vld [vmem:[#allocation2 + $0x8] sm:$0xff]  ;;  %2117 = vmatpush3.bf16.msra.mxu0 %v2307_v32  ;;  %s2413_s11 = smov 8   ;;  %s2414_s12 = smov 16  }
 0x156   : > { %v493_v35 = vpack.c.bf16 %v2543_v34, %v2541_v33  ;;  %2128 = vmatprep.subr.bf16.mxu0 %v2400_v31  ;;  %s2415_s18 = smov 24   ;;  %p2051_p5 = scmp.ne.s32.totalorder %s2480_s14, 1 }
 0x157   : > { %vm2417_vm8 = vmmov (!%p2051_p5), 0   ;;  %vm1817_vm9 = vcmask (!%p2051_p5), 1040384  }
 0x158   : > { %2119 = vmatmul.mubr.msk.bf16.vlgmr.msra.gmra.mrb[0].mxu0 %vm515_vm2, %v493_v35 }
 0x159   : > { %2130 = vmatprep.mubr.msk.bf16.mxu0 %vm2401_vm1, %v2400_v31 }
 0x22b   : > { %v553_v37 = vpop.f32.mrb[0].mxu0 }
 0x22c   : > { %v554_v38 = vadd.f32 %v2009_v36, %v553_v37  ;;  %v2120_v39 = vpop.f32.mrb[1].mxu0 }
 0x22d   : > { %v556_v40 = vpop.f32.mrb[2].mxu0 }
 0x22e   : > { %v2555_v41 = vpack.c.bf16 %v554_v38, %v554_v38  ;;  %v557_v42 = vadd.f32 %v2009_v36, %v556_v40  ;;  %v2121_v43 = vpop.f32.mrb[3].mxu0 }
 0x230   : > { %580 = vrot.lane.b32.xlu0 %v2555_v41, %s2402_s20  ;;  %v2558_v44 = vpack.c.bf16 %v557_v42, %v557_v42 }
 0x234   : > { %629 = vrot.lane.b32.xlu0 %v2558_v44, %s2402_s20  ;;  %s2412_s20 = smov 40  }
 0x2a2   : > { %v581_v45 = vpop.permute.xlu0 %580 }
 0x2a3   : > { %v587_v46 = vsel %vm582_vm3, %v581_v45, 0 }
 0x2a4   : > { %2123 = vmatpush3.bf16.xpose.msra.mxu1 %v587_v46 }
 0x2a5   : > { %2134 = vmatprep.subr.bf16.mxu1 %v2400_v31 }
 0x2a6   : > { %v630_v47 = vpop.permute.xlu0 %629 }
 0x2a7   : > { %v635_v48 = vsel %vm582_vm3, %v630_v47, 0 }
 0x2a8   : > { %2129 = vmatpush3.bf16.xpose.msra.mxu0 %v635_v48 }
 0x2a9   : > { %2140 = vmatprep.subr.bf16.mxu0 %v2400_v31 }
 0x2ab   : > { %2125 = vmatmul.mubr.msk.bf16.vlgmr.msra.gmra.mrb[0].mxu1 %vm582_vm3, %v2555_v41 }
 0x2ac   : > { %2136 = vmatprep.mubr.msk.bf16.mxu1 %vm2401_vm1, %v2400_v31 }
 0x2af   : > { %2131 = vmatmul.mubr.msk.bf16.vlgmr.msra.gmra.mrb[4].mxu0 %vm582_vm3, %v2558_v44 }
 0x2b0   : > { %2142 = vmatprep.mubr.msk.bf16.mxu0 %vm2401_vm1, %v2400_v31 }
 0x37e   : > { %v623_v50 = vpop.f32.mrb[0].mxu1 }
 0x37f   : > { %v624_v51 = vadd.f32 %v2576_v49, %v623_v50  ;;  %v2126_v52 = vpop.f32.mrb[1].mxu1 }
 0x380   : > { %v626_v53 = vpop.f32.mrb[2].mxu1 }
 0x381   : > { %v2127_v55 = vpop.f32.mrb[3].mxu1  ;;  %v677_v56 = vsel %vm582_vm3, %v624_v51, -inf }
 0x382   : > { %678 = vmax.xlane.f32.xlu1 %v677_v56  ;;  %v671_v57 = vpop.f32.mrb[4].mxu0 }
 0x383   : > { %v672_v58 = vadd.f32 %v2582_v54, %v671_v57  ;;  %v2132_v59 = vpop.f32.mrb[5].mxu0 }
 0x384   : > { %v674_v60 = vpop.f32.mrb[6].mxu0 }
 0x385   : > { %v2133_v61 = vpop.f32.mrb[7].mxu0  ;;  %v680_v62 = vsel %vm582_vm3, %v672_v58, -inf }
 0x386   : > { %681 = vmax.xlane.f32.xlu1 %v680_v62 }
 0x397   : > { %701 = vrot.lane.b32.xlu1 %v2555_v41, %s2403_s22 }
 0x39b   : > { %750 = vrot.lane.b32.xlu1 %v2558_v44, %s2403_s22 }
 0x39f   : > { %800 = vrot.lane.b32.xlu1 %v2555_v41, %s2404_s16 }
 0x40f   : > { %v679_v63 = vpop.xlane.xlu1 %678 }
 0x410   : > { %v683_v0 = vsub.f32 %v624_v51, %v679_v63 }
 0x412   : > { %v685_v1 = vmul.f32 1.442695, %v683_v0 }
 0x413   : > { %v682_v2 = vpop.xlane.xlu1 %681 }
 0x414   : > { %2316 = vpow2.f32 %v685_v1  ;;  %v684_v3 = vsub.f32 %v672_v58, %v682_v2 }
 0x416   : > { %v687_v4 = vmul.f32 1.442695, %v684_v3 }
 0x417   : > { %v702_v5 = vpop.permute.xlu1 %701 }
 0x418   : > { %2318 = vpow2.f32 %v687_v4  ;;  %v708_v6 = vsel %vm706_vm4, %v702_v5, 0 }
 0x419   : > { %2135 = vmatpush3.bf16.msra.mxu1 %v708_v6 }
 0x41a   : > { %2146 = vmatprep.subr.bf16.mxu1 %v2400_v31 }
 0x41b   : > { %v751_v7 = vpop.permute.xlu1 %750 }
 0x41c   : > { %v756_v8 = vsel %vm706_vm4, %v751_v7, 0 }
 0x41d   : > { %2141 = vmatpush3.bf16.msra.mxu0 %v756_v8 }
 0x41e   : > { %v2317_v9 = vpop.eup %2316  ;;  %2152 = vmatprep.subr.bf16.mxu0 %v2400_v31 }
 0x41f   : > { %v689_v10 = vsel %vm582_vm3, %v2317_v9, 0.0  ;;  %v801_v13 = vpop.permute.xlu1 %800 }
 0x420   : > { %690 = vadd.xlane.f32.xlu0 %v689_v10  ;;  %v806_v20 = vsel %vm582_vm3, %v801_v13, 0 }
 0x422   : > { %v2319_v11 = vpop.eup %2318 }
 0x423   : > { %v692_v12 = vsel %vm582_vm3, %v2319_v11, 0.0 }
 0x424   : > { %693 = vadd.xlane.f32.xlu1 %v692_v12 }
 0x435   : > { %850 = vrot.lane.b32.xlu1 %v2558_v44, %s2404_s16 }
 0x436   : > { %798 = vrot.lane.b32.xlu0 %v2555_v41, %s2405_s24 }
 0x439   : > { %848 = vrot.lane.b32.xlu1 %v2558_v44, %s2405_s24 }
 0x4ad   : > { %v691_v14 = vpop.xlane.xlu0 %690 }
 0x4ae   : > { %2320 = vrcp.f32 %v691_v14 }
 0x4b1   : > { %v694_v15 = vpop.xlane.xlu1 %693  ;;  %v799_v25 = vpop.permute.xlu0 %798 }
 0x4b2   : > { %2322 = vrcp.f32 %v694_v15 }
 0x4b5   : > { %v851_v22 = vpop.permute.xlu1 %850 }
 0x4b6   : > { %v856_v24 = vsel %vm582_vm3, %v851_v22, 0 }
 0x4b8   : > { %v2321_v16 = vpop.eup %2320 }
 0x4b9   : > { %v697_v17 = vmul.f32 %v2321_v16, %v2317_v9  ;;  %v849_v26 = vpop.permute.xlu1 %848 }
 0x4bb   : > { %v699_v18 = vpack.c.bf16 %v697_v17, %v697_v17 }
 0x4bc   : > { %v2323_v19 = vpop.eup %2322 }
 0x4bd   : > { %v698_v21 = vmul.f32 %v2323_v19, %v2319_v11  ;;  %2137 = vmatmul.mubr.msk.bf16.vlgmr.msra.gmra.mrb[4].mxu1 %vm582_vm3, %v699_v18 }
 0x4be   : > { %2147 = vmatpush3.bf16.xpose.msra.mxu1 %v806_v20  ;;  %2148 = vmatprep.mubr.msk.bf16.mxu1 %vm2401_vm1, %v2400_v31 }
 0x4bf   : > { %v700_v23 = vpack.c.bf16 %v698_v21, %v698_v21  ;;  %2158 = vmatprep.subr.bf16.mxu1 %v2400_v31 }
 0x4c1   : > { %2143 = vmatmul.mubr.msk.bf16.vlgmr.msra.gmra.mrb[8].mxu0 %vm582_vm3, %v700_v23 }
 0x4c2   : > { %2153 = vmatpush3.bf16.xpose.msra.mxu0 %v856_v24  ;;  %2154 = vmatprep.mubr.msk.bf16.mxu0 %vm2401_vm1, %v2400_v31 }
 0x4c3   : > { %2164 = vmatprep.subr.bf16.mxu0 %v2400_v31 }
 0x4c5   : > { %2149 = vmatmul.mubr.msk.bf16.vlgmr.msra.gmra.mrb[8].mxu1 %vm582_vm3, %v799_v25 }
 0x4c6   : > { %2160 = vmatprep.mubr.msk.bf16.mxu1 %vm2401_vm1, %v2400_v31 }
 0x4c9   : > { %2155 = vmatmul.mubr.msk.bf16.vlgmr.msra.gmra.mrb[12].mxu0 %vm582_vm3, %v849_v26 }
 0x4ca   : > { %2166 = vmatprep.mubr.msk.bf16.mxu0 %vm2401_vm1, %v2400_v31 }
 0x590   : > { %v2615_v27 = vpop.f32.mrb[4].mxu1 }
 0x591   : > { %v2138_v28 = vpop.f32.mrb[5].mxu1 }
 0x592   : > { %v747_v29 = vpop.f32.mrb[6].mxu1 }
 0x593   : > { %v2139_v30 = vpop.f32.mrb[7].mxu1 }
 0x594   : > { %v2617_v32 = vpop.f32.mrb[8].mxu0 }
 0x595   : > { %v2144_v35 = vpop.f32.mrb[9].mxu0 }
 0x596   : > { %v795_v36 = vpop.f32.mrb[10].mxu0 }
 0x597   : > { %v2145_v37 = vpop.f32.mrb[11].mxu0 }
 0x598   : > { %v842_v38 = vpop.f32.mrb[8].mxu1 }
 0x599   : > { %v843_v39 = vadd.f32 %v2576_v49, %v842_v38  ;;  %v2150_v40 = vpop.f32.mrb[9].mxu1 }
 0x59a   : > { %v845_v42 = vpop.f32.mrb[10].mxu1 }
 0x59b   : > { %v2151_v43 = vpop.f32.mrb[11].mxu1  ;;  %v898_v45 = vsel %vm582_vm3, %v843_v39, -inf }
 0x59c   : > { %899 = vmax.xlane.f32.xlu1 %v898_v45  ;;  %v892_v46 = vpop.f32.mrb[12].mxu0 }
 0x59d   : > { %v893_v47 = vadd.f32 %v2582_v54, %v892_v46  ;;  %v2156_v48 = vpop.f32.mrb[13].mxu0 }
 0x59e   : > { %v895_v50 = vpop.f32.mrb[14].mxu0 }
 0x59f   : > { %v2157_v51 = vpop.f32.mrb[15].mxu0  ;;  %v901_v52 = vsel %vm582_vm3, %v893_v47, -inf }
 0x5a0   : > { %902 = vmax.xlane.f32.xlu0 %v901_v52 }
 0x5ad   : > { %922 = vrot.lane.b32.xlu1 %v2555_v41, %s2406_s17 }
 0x5b1   : > { %1020 = vrot.lane.b32.xlu1 %v2555_v41, %s2407_s15 }
 0x5b6   : > { %970 = vrot.lane.b32.xlu0 %v2558_v44, %s2406_s17 }
 0x5ba   : > { %1018 = vrot.lane.b32.xlu0 %v2555_v41, %s2408_s25 }
 0x629   : > { %v900_v53 = vpop.xlane.xlu1 %899 }
 0x62a   : > { %v904_v55 = vsub.f32 %v843_v39, %v900_v53 }
 0x62c   : > { %v906_v56 = vmul.f32 1.442695, %v904_v55 }
 0x62d   : > { %v923_v57 = vpop.permute.xlu1 %922  ;;  %v903_v58 = vpop.xlane.xlu0 %902 }
 0x62e   : > { %2324 = vpow2.f32 %v906_v56  ;;  %v928_v59 = vsel %vm706_vm4, %v923_v57, 0  ;;  %v905_v60 = vsub.f32 %v893_v47, %v903_v58 }
 0x62f   : > { %2159 = vmatpush3.bf16.msra.mxu1 %v928_v59 }
 0x630   : > { %v908_v61 = vmul.f32 1.442695, %v905_v60  ;;  %2170 = vmatprep.subr.bf16.mxu1 %v2400_v31 }
 0x631   : > { %v971_v62 = vpop.permute.xlu0 %970  ;;  %v1021_v4 = vpop.permute.xlu1 %1020 }
 0x632   : > { %2326 = vpow2.f32 %v908_v61  ;;  %v976_v63 = vsel %vm706_vm4, %v971_v62, 0  ;;  %v1026_v11 = vsel %vm582_vm3, %v1021_v4, 0 }
 0x633   : > { %2165 = vmatpush3.bf16.msra.mxu0 %v976_v63 }
 0x634   : > { %2176 = vmatprep.subr.bf16.mxu0 %v2400_v31 }
 0x635   : > { %v1019_v16 = vpop.permute.xlu0 %1018 }
 0x638   : > { %v2325_v0 = vpop.eup %2324 }
 0x639   : > { %v910_v1 = vsel %vm582_vm3, %v2325_v0, 0.0 }
 0x63a   : > { %911 = vadd.xlane.f32.xlu1 %v910_v1 }
 0x63c   : > { %v2327_v2 = vpop.eup %2326 }
 0x63d   : > { %v913_v3 = vsel %vm582_vm3, %v2327_v2, 0.0 }
 0x63e   : > { %914 = vadd.xlane.f32.xlu1 %v913_v3 }
 0x64f   : > { %1070 = vrot.lane.b32.xlu1 %v2558_v44, %s2407_s15 }
 0x653   : > { %1068 = vrot.lane.b32.xlu1 %v2558_v44, %s2408_s25 }
 0x6c7   : > { %v912_v5 = vpop.xlane.xlu1 %911 }
 0x6c8   : > { %2328 = vrcp.f32 %v912_v5 }
 0x6cb   : > { %v915_v6 = vpop.xlane.xlu1 %914 }
 0x6cc   : > { %2330 = vrcp.f32 %v915_v6 }
 0x6cf   : > { %v1071_v13 = vpop.permute.xlu1 %1070 }
 0x6d0   : > { %v1076_v15 = vsel %vm582_vm3, %v1071_v13, 0 }
 0x6d2   : > { %v2329_v7 = vpop.eup %2328 }
 0x6d3   : > { %v918_v8 = vmul.f32 %v2329_v7, %v2325_v0  ;;  %v1069_v17 = vpop.permute.xlu1 %1068 }
 0x6d5   : > { %v920_v9 = vpack.c.bf16 %v918_v8, %v918_v8 }
 0x6d6   : > { %v2331_v10 = vpop.eup %2330 }
 0x6d7   : > { %v919_v12 = vmul.f32 %v2331_v10, %v2327_v2  ;;  %2161 = vmatmul.mubr.msk.bf16.vlgmr.msra.gmra.mrb[12].mxu1 %vm582_vm3, %v920_v9 }
 0x6d8   : > { %2171 = vmatpush3.bf16.xpose.msra.mxu1 %v1026_v11  ;;  %2172 = vmatprep.mubr.msk.bf16.mxu1 %vm2401_vm1, %v2400_v31 }
 0x6d9   : > { %v921_v14 = vpack.c.bf16 %v919_v12, %v919_v12  ;;  %2182 = vmatprep.subr.bf16.mxu1 %v2400_v31 }
 0x6db   : > { %2167 = vmatmul.mubr.msk.bf16.vlgmr.msra.gmra.mrb[16].mxu0 %vm582_vm3, %v921_v14 }
 0x6dc   : > { %2177 = vmatpush3.bf16.xpose.msra.mxu0 %v1076_v15  ;;  %2178 = vmatprep.mubr.msk.bf16.mxu0 %vm2401_vm1, %v2400_v31 }
 0x6dd   : > { %2188 = vmatprep.subr.bf16.mxu0 %v2400_v31 }
 0x6df   : > { %2173 = vmatmul.mubr.msk.bf16.vlgmr.msra.gmra.mrb[16].mxu1 %vm582_vm3, %v1019_v16 }
 0x6e0   : > { %2184 = vmatprep.mubr.msk.bf16.mxu1 %vm2401_vm1, %v2400_v31 }
 0x6e3   : > { %2179 = vmatmul.mubr.msk.bf16.vlgmr.msra.gmra.mrb[20].mxu0 %vm582_vm3, %v1069_v17 }
 0x6e4   : > { %2190 = vmatprep.mubr.msk.bf16.mxu0 %vm2401_vm1, %v2400_v31 }
 0x7aa   : > { %v2651_v18 = vpop.f32.mrb[12].mxu1 }
 0x7ab   : > { %v2162_v19 = vpop.f32.mrb[13].mxu1 }
 0x7ac   : > { %v967_v20 = vpop.f32.mrb[14].mxu1 }
 0x7ad   : > { %v2163_v21 = vpop.f32.mrb[15].mxu1 }
 0x7ae   : > { %v2653_v22 = vpop.f32.mrb[16].mxu0 }
 0x7af   : > { %v2291_v23 = vpack.i.bf16 %v2653_v22, %v2651_v18  ;;  %v2168_v24 = vpop.f32.mrb[17].mxu0 }
 0x7b0   : > { %v1015_v25 = vpop.f32.mrb[18].mxu0 }
 0x7b1   : > { %v2169_v26 = vpop.f32.mrb[19].mxu0 }
 0x7b2   : > { %v1062_v28 = vpop.f32.mrb[16].mxu1 }
 0x7b3   : > { %v1063_v29 = vadd.f32 %v2576_v49, %v1062_v28  ;;  %v2174_v30 = vpop.f32.mrb[17].mxu1 }
 0x7b4   : > { %v1065_v35 = vpop.f32.mrb[18].mxu1 }
 0x7b5   : > { %v2175_v36 = vpop.f32.mrb[19].mxu1  ;;  %v1118_v37 = vsel %vm582_vm3, %v1063_v29, -inf }
 0x7b6   : > { %1119 = vmax.xlane.f32.xlu0 %v1118_v37  ;;  %v1112_v38 = vpop.f32.mrb[20].mxu0 }
 0x7b7   : > { %v1113_v39 = vadd.f32 %v2582_v54, %v1112_v38  ;;  %v2180_v40 = vpop.f32.mrb[21].mxu0 }
 0x7b8   : > { %v1115_v42 = vpop.f32.mrb[22].mxu0 }
 0x7b9   : > { %v2181_v43 = vpop.f32.mrb[23].mxu0  ;;  %v1121_v45 = vsel %vm582_vm3, %v1113_v39, -inf }
 0x7ba   : > { %1122 = vmax.xlane.f32.xlu1 %v1121_v45 }
 0x7cb   : > { %1142 = vrot.lane.b32.xlu1 %v2555_v41, %s2409_s27 }
 0x7cf   : > { %1240 = vrot.lane.b32.xlu1 %v2555_v41, %s2410_s28 }
 0x7d3   : > { %1290 = vrot.lane.b32.xlu1 %v2558_v44, %s2410_s28 }
 0x7d7   : > { %1288 = vrot.lane.b32.xlu1 %v2558_v44, %s2411_s30 }
 0x843   : > { %v1120_v46 = vpop.xlane.xlu0 %1119 }
 0x844   : > { %v1124_v47 = vsub.f32 %v1063_v29, %v1120_v46 }
 0x846   : > { %v1126_v48 = vmul.f32 1.442695, %v1124_v47 }
 0x847   : > { %v1123_v50 = vpop.xlane.xlu1 %1122 }
 0x848   : > { %2332 = vpow2.f32 %v1126_v48  ;;  %v1125_v51 = vsub.f32 %v1113_v39, %v1123_v50 }
 0x84a   : > { %v1128_v52 = vmul.f32 1.442695, %v1125_v51 }
 0x84b   : > { %v1143_v53 = vpop.permute.xlu1 %1142 }
 0x84c   : > { %2334 = vpow2.f32 %v1128_v52  ;;  %v1148_v55 = vsel %vm706_vm4, %v1143_v53, 0 }
 0x84d   : > { %2183 = vmatpush3.bf16.msra.mxu1 %v1148_v55 }
 0x84e   : > { %2194 = vmatprep.subr.bf16.mxu1 %v2400_v31 }
 0x84f   : > { %v1241_v1 = vpop.permute.xlu1 %1240 }
 0x850   : > { %v1246_v5 = vsel %vm582_vm3, %v1241_v1, 0 }
 0x852   : > { %v2333_v56 = vpop.eup %2332 }
 0x853   : > { %v1130_v57 = vsel %vm582_vm3, %v2333_v56, 0.0  ;;  %v1291_v7 = vpop.permute.xlu1 %1290 }
 0x854   : > { %1131 = vadd.xlane.f32.xlu0 %v1130_v57  ;;  %v1296_v9 = vsel %vm582_vm3, %v1291_v7, 0 }
 0x856   : > { %v2335_v58 = vpop.eup %2334 }
 0x857   : > { %v1133_v59 = vsel %vm582_vm3, %v2335_v58, 0.0  ;;  %v1289_v11 = vpop.permute.xlu1 %1288 }
 0x858   : > { %1134 = vadd.xlane.f32.xlu0 %v1133_v59 }
 0x86e   : > { %1190 = vrot.lane.b32.xlu0 %v2558_v44, %s2409_s27 }
 0x872   : > { %1238 = vrot.lane.b32.xlu0 %v2555_v41, %s2411_s30 }
 0x8e1   : > { %v1132_v60 = vpop.xlane.xlu0 %1131 }
 0x8e2   : > { %2336 = vrcp.f32 %v1132_v60  ;;  %v2308_v60 = vld [vmem:[%s2494_s23] sm:$0xff]  }
 0x8e5   : > { %v1135_v61 = vpop.xlane.xlu0 %1134 }
 0x8e6   : > { %2338 = vrcp.f32 %v1135_v61  ;;  %v2309_v61 = vld [vmem:[%s2494_s23 + $0x8] sm:$0xff]  }
 0x8e9   : > { %v1191_v62 = vpop.permute.xlu0 %1190 }
 0x8ea   : > { %v1196_v63 = vsel %vm706_vm4, %v1191_v62, 0 }
 0x8eb   : > { %2189 = vmatpush3.bf16.msra.mxu0 %v1196_v63 }
 0x8ec   : > { %v2337_v0 = vpop.eup %2336  ;;  %2200 = vmatprep.subr.bf16.mxu0 %v2400_v31 }
 0x8ed   : > { %v1138_v2 = vmul.f32 %v2337_v0, %v2333_v56  ;;  %v1239_v10 = vpop.permute.xlu0 %1238 }
 0x8ef   : > { %v1140_v3 = vpack.c.bf16 %v1138_v2, %v1138_v2 }
 0x8f0   : > { %v2339_v4 = vpop.eup %2338 }
 0x8f1   : > { %v1139_v6 = vmul.f32 %v2339_v4, %v2335_v58  ;;  %2185 = vmatmul.mubr.msk.bf16.vlgmr.msra.gmra.mrb[20].mxu1 %vm582_vm3, %v1140_v3 }
 0x8f2   : > { %2195 = vmatpush3.bf16.xpose.msra.mxu1 %v1246_v5  ;;  %2196 = vmatprep.mubr.msk.bf16.mxu1 %vm2401_vm1, %v2400_v31 }
 0x8f3   : > { %v1141_v8 = vpack.c.bf16 %v1139_v6, %v1139_v6  ;;  %2206 = vmatprep.subr.bf16.mxu1 %v2400_v31 }
 0x8f5   : > { %2191 = vmatmul.mubr.msk.bf16.vlgmr.msra.gmra.mrb[24].mxu0 %vm582_vm3, %v1141_v8 }
 0x8f6   : > { %2201 = vmatpush3.bf16.xpose.msra.mxu0 %v1296_v9  ;;  %2202 = vmatprep.mubr.msk.bf16.mxu0 %vm2401_vm1, %v2400_v31 }
 0x8f7   : > { %2212 = vmatprep.subr.bf16.mxu0 %v2400_v31 }
 0x8f9   : > { %2197 = vmatmul.mubr.msk.bf16.vlgmr.msra.gmra.mrb[24].mxu1 %vm582_vm3, %v1239_v10 }
 0x8fa   : > { %2208 = vmatprep.mubr.msk.bf16.mxu1 %vm2401_vm1, %v2400_v31 }
 0x8fd   : > { %2203 = vmatmul.mubr.msk.bf16.vlgmr.msra.gmra.mrb[28].mxu0 %vm582_vm3, %v1289_v11 }
 0x8fe   : > { %2214 = vmatprep.mubr.msk.bf16.mxu0 %vm2401_vm1, %v2400_v31 }
 0x9c4   : > { %v1184_v12 = vpop.f32.mrb[20].mxu1 }
 0x9c5   : > { %v2186_v13 = vpop.f32.mrb[21].mxu1 }
 0x9c6   : > { %v1187_v14 = vpop.f32.mrb[22].mxu1 }
 0x9c7   : > { %v2187_v15 = vpop.f32.mrb[23].mxu1 }
 0x9c8   : > { %v1232_v16 = vpop.f32.mrb[24].mxu0 }
 0x9c9   : > { %v2296_v17 = vpack.i.bf16 %v1232_v16, %v1184_v12  ;;  %v2192_v19 = vpop.f32.mrb[25].mxu0 }
 0x9ca   : > { %v1235_v20 = vpop.f32.mrb[26].mxu0 }
 0x9cb   : > { %v2193_v21 = vpop.f32.mrb[27].mxu0 }
 0x9cc   : > { %v1282_v24 = vpop.f32.mrb[24].mxu1 }
 0x9cd   : > { %v1283_v25 = vadd.f32 %v2576_v49, %v1282_v24  ;;  %v2198_v26 = vpop.f32.mrb[25].mxu1 }
 0x9ce   : > { %v1285_v28 = vpop.f32.mrb[26].mxu1  ;;  %v2033_v26 = vld [vmem:[%s2514_s3] ss:$0 sm:$0xff] }
 0x9cf   : > { %v2199_v29 = vpop.f32.mrb[27].mxu1  ;;  %v1338_v30 = vsel %vm582_vm3, %v1283_v25, -inf }
 0x9d0   : > { %1339 = vmax.xlane.f32.xlu0 %v1338_v30  ;;  %v1332_v35 = vpop.f32.mrb[28].mxu0 }
 0x9d1   : > { %v1333_v36 = vadd.f32 %v2582_v54, %v1332_v35  ;;  %v2204_v37 = vpop.f32.mrb[29].mxu0 }
 0x9d2   : > { %v1335_v38 = vpop.f32.mrb[30].mxu0 }
 0x9d3   : > { %v2205_v39 = vpop.f32.mrb[31].mxu0  ;;  %v1341_v40 = vsel %vm582_vm3, %v1333_v36, -inf }
 0x9d4   : > { %1342 = vmax.xlane.f32.xlu1 %v1341_v40 }
 0x9e5   : > { %1362 = vrot.lane.b32.xlu1 %v2555_v41, %s2412_s20 }
 0x9e9   : > { %2292 = vrot.lane.b32.xlu1 %v2291_v23, %s2413_s11 }
 0x9ed   : > { %2297 = vrot.lane.b32.xlu1 %v2296_v17, %s2414_s12 }
 0xa5d   : > { %v1340_v49 = vpop.xlane.xlu0 %1339 }
 0xa5e   : > { %v1344_v42 = vsub.f32 %v1283_v25, %v1340_v49 }
 0xa60   : > { %v1346_v43 = vmul.f32 1.442695, %v1344_v42 }
 0xa61   : > { %v1343_v54 = vpop.xlane.xlu1 %1342 }
 0xa62   : > { %2340 = vpow2.f32 %v1346_v43  ;;  %v1345_v45 = vsub.f32 %v1333_v36, %v1343_v54 }
 0xa64   : > { %v1348_v46 = vmul.f32 1.442695, %v1345_v45 }
 0xa65   : > { %v1363_v47 = vpop.permute.xlu1 %1362 }
 0xa66   : > { %2342 = vpow2.f32 %v1348_v46  ;;  %v1368_v48 = vsel %vm706_vm4, %v1363_v47, 0 }
 0xa67   : > { %2207 = vmatpush3.bf16.msra.mxu1 %v1368_v48 }
 0xa68   : > { %2218 = vmatprep.subr.bf16.mxu1 %v2400_v31 }
 0xa69   : > { %v2293_v7 = vpop.permute.xlu1 %2292 }
 0xa6a   : > { %v2295_v9 = vunpack.i.h.bf16 %v2293_v7  ;;  %v2294_v10 = vunpack.i.l.bf16 %v2293_v7 }
 0xa6c   : > { %v2341_v41 = vpop.eup %2340  ;;  %v1483_v14 = vsel %vm582_vm3, %v2617_v32, %v2295_v9  ;;  %v1482_v15 = vsel %vm582_vm3, %v2615_v27, %v2294_v10 }
 0xa6d   : > { %v1350_v18 = vsel %vm582_vm3, %v2341_v41, 0.0  ;;  %v2298_v8 = vpop.permute.xlu1 %2297 }
 0xa6e   : > { %1351 = vadd.xlane.f32.xlu0 %v1350_v18  ;;  %v2300_v11 = vunpack.i.h.bf16 %v2298_v8  ;;  %v2299_v12 = vunpack.i.l.bf16 %v2298_v8 }
 0xa70   : > { %v2343_v22 = vpop.eup %2342  ;;  %v1485_v19 = vsel %vm1484_vm5, %v1482_v15, %v2299_v12  ;;  %v1486_v20 = vsel %vm1484_vm5, %v1483_v14, %v2300_v11 }
 0xa71   : > { %v1353_v23 = vsel %vm582_vm3, %v2343_v22, 0.0 }
 0xa72   : > { %1354 = vadd.xlane.f32.xlu0 %v1353_v23 }
 0xa88   : > { %1410 = vrot.lane.b32.xlu0 %v2558_v44, %s2412_s20 }
 0xafb   : > { %v1352_v50 = vpop.xlane.xlu0 %1351 }
 0xafc   : > { %2344 = vrcp.f32 %v1352_v50 }
 0xaff   : > { %v1355_v51 = vpop.xlane.xlu0 %1354 }
 0xb00   : > { %2346 = vrcp.f32 %v1355_v51 }
 0xb03   : > { %v1411_v52 = vpop.permute.xlu0 %1410 }
 0xb04   : > { %v1416_v53 = vsel %vm706_vm4, %v1411_v52, 0 }
 0xb05   : > { %2213 = vmatpush3.bf16.msra.mxu0 %v1416_v53 }
 0xb06   : > { %v2345_v55 = vpop.eup %2344  ;;  %2226 = vmatprep.subr.bf16.mxu0 %v2400_v31 }
 0xb07   : > { %v1358_v56 = vmul.f32 %v2345_v55, %v2341_v41  ;;  %v2311_v41 = vld [vmem:[%s2499_s26 + $0x8] sm:$0xff]   ;;  %v2037_v55 = vld [vmem:[%s2514_s3 + $0x1] ss:$0 sm:$0xff] }
 0xb09   : > { %v1360_v57 = vpack.c.bf16 %v1358_v56, %v1358_v56 }
 0xb0a   : > { %v2347_v58 = vpop.eup %2346 }
 0xb0b   : > { %v1359_v59 = vmul.f32 %v2347_v58, %v2343_v22  ;;  %2209 = vmatmul.mubr.msk.bf16.vlgmr.msra.gmra.mrb[28].mxu1 %vm582_vm3, %v1360_v57 }
 0xb0c   : > { %2222 = vmatprep.mubr.msk.bf16.mxu1 %vm2401_vm1, %v2400_v31  ;;  %2219 = vmatpush3.bf16.msra.mxu1 %v2308_v60 }
 0xb0d   : > { %v1361_v44 = vpack.c.bf16 %v1359_v59, %v1359_v59  ;;  %2220 = vmatprep.subr.bf16.mxu1 %v2400_v31 }
 0xb0f   : > { %2215 = vmatmul.mubr.msk.bf16.vlgmr.msra.gmra.mrb[32].mxu0 %vm582_vm3, %v1361_v44  ;;  %v2038_v44 = vld [vmem:[%s2514_s3 + $0x2] ss:$0 sm:$0xff] }
 0xb10   : > { %2230 = vmatprep.mubr.msk.bf16.mxu0 %vm2401_vm1, %v2400_v31  ;;  %2221 = vmatpush3.bf16.msra.mxu1 %v2309_v61 }
 0xb11   : > { %2234 = vmatprep.subr.bf16.mxu1 %v2400_v31 }
 0xbde   : > { %v1404_v62 = vpop.f32.mrb[28].mxu1 }
 0xbdf   : > { %v2210_v63 = vpop.f32.mrb[29].mxu1 }
 0xbe0   : > { %v1407_v0 = vpop.f32.mrb[30].mxu1 }
 0xbe1   : > { %v2211_v1 = vpop.f32.mrb[31].mxu1  ;;  %v2312_v0 = vld [vmem:[%s2504_s29] sm:$0xff]  }
 0xbe2   : > { %v1452_v2 = vpop.f32.mrb[32].mxu0  ;;  %v2313_v1 = vld [vmem:[%s2504_s29 + $0x8] sm:$0xff]  }
 0xbe3   : > { %v2301_v3 = vpack.i.bf16 %v1452_v2, %v1404_v62  ;;  %v2216_v4 = vpop.f32.mrb[33].mxu0  ;;  %v2314_v2 = vld [vmem:[%s2504_s29 + $0x10] sm:$0xff]  }
 0xbe4   : > { %v1455_v5 = vpop.f32.mrb[34].mxu0  ;;  %v2039_v4 = vld [vmem:[%s2509_s19 + $0x1] ss:$0 sm:$0xff] }
 0xbe5   : > { %2302 = vrot.lane.b32.xlu0 %v2301_v3, %s2415_s18  ;;  %v2217_v6 = vpop.f32.mrb[35].mxu0  ;;  %v2315_v3 = vld [vmem:[%s2504_s29 + $0x18] sm:$0xff]  }
 0xc57   : > { %v2303_v13 = vpop.permute.xlu0 %2302 }
 0xc58   : > { %v2305_v16 = vunpack.i.h.bf16 %v2303_v13  ;;  %v2304_v17 = vunpack.i.l.bf16 %v2303_v13 }
 0xc5a   : > { %v1489_v21 = vsel %vm1487_vm6, %v1486_v20, %v2305_v16  ;;  %v1488_v24 = vsel %vm1487_vm6, %v1485_v19, %v2304_v17 }
 0xc5b   : > { %v1490_v25 = vpack.c.bf16 %v1489_v21, %v1488_v24 }
 0xc5d   : > { %2223 = vmatmul.mubr.msk.bf16.vlgmr.msra.gmra.mrb[32].mxu1 %vm515_vm2, %v1490_v25 }
 0xc5e   : > { %2242 = vmatprep.mubr.msk.bf16.mxu1 %vm2401_vm1, %v2400_v31  ;;  %2235 = vmatpush3.bf16.msra.mxu1 %v2312_v0 }
 0xc5f   : > { %2236 = vmatprep.subr.bf16.mxu1 %v2400_v31 }
 0xc62   : > { %2237 = vmatpush3.bf16.msra.mxu1 %v2313_v1 }
 0xc63   : > { %2238 = vmatprep.subr.bf16.mxu1 %v2400_v31 }
 0xc66   : > { %2239 = vmatpush3.bf16.msra.mxu1 %v2314_v2 }
 0xc67   : > { %2240 = vmatprep.subr.bf16.mxu1 %v2400_v31 }
 0xc6a   : > { %2241 = vmatpush3.bf16.msra.mxu1 %v2315_v3  ;;  %v2360_v3 = vld [vmem:[%s2797_s9] sm:$0xff] (!%p2051_p5)  }
 0xd30   : > { %v1549_v28 = vpop.f32.mrb[32].mxu1 }
 0xd31   : > { %v1550_v29 = vadd.f32 %v2033_v26, %v1549_v28  ;;  %v2224_v30 = vpop.f32.mrb[33].mxu1 }
 0xd32   : > { %v1552_v32 = vpop.f32.mrb[34].mxu1 }
 0xd33   : > { %v1553_v35 = vadd.f32 %v2033_v26, %v1552_v32  ;;  %v2225_v36 = vpop.f32.mrb[35].mxu1  ;;  %v1556_v27 = vadd.f32 %v1550_v29, %v2541_v33 }
 0xd34   : > { %v2043_v36 = vld [vmem:[%s2514_s3 + $0x3] ss:$0 sm:$0xff] }
 0xd35   : > { %v1560_v37 = vsel %vm515_vm2, %v1556_v27, 0.0  ;;  %v1557_v38 = vadd.f32 %v1553_v35, %v2543_v34  ;;  %v2310_v34 = vld [vmem:[%s2499_s26] sm:$0xff]  }
 0xd36   : > { %1561 = vadd.xlane.f32.xlu1 %v1560_v37  ;;  %2227 = vmatpush3.bf16.msra.mxu0 %v2310_v34 }
 0xd37   : > { %v1563_v39 = vsel %vm515_vm2, %v1557_v38, 0.0  ;;  %2228 = vmatprep.subr.bf16.mxu0 %v2400_v31 }
 0xd38   : > { %1564 = vadd.xlane.f32.xlu0 %v1563_v39 }
 0xd3a   : > { %2229 = vmatpush3.bf16.msra.mxu0 %v2311_v41 }
 0xdc3   : > { %v1562_v40 = vpop.xlane.xlu1 %1561 }
 0xdc4   : > { %v1567_v49 = vmul.f32 0.03125, %v1562_v40 }
 0xdc5   : > { %v1565_v42 = vpop.xlane.xlu0 %1564 }
 0xdc6   : > { %v1569_v43 = vsub.f32 %v1556_v27, %v1567_v49  ;;  %v1568_v54 = vmul.f32 0.03125, %v1565_v42 }
 0xdc8   : > { %v1570_v45 = vsub.f32 %v1557_v38, %v1568_v54  ;;  %v1571_v46 = vmul.f32 %v1569_v43, %v1569_v43 }
 0xdca   : > { %v1573_v47 = vsel %vm515_vm2, %v1571_v46, 0.0  ;;  %v1572_v33 = vmul.f32 %v1570_v45, %v1570_v45 }
 0xdcb   : > { %1574 = vadd.xlane.f32.xlu0 %v1573_v47 }
 0xdcc   : > { %v1576_v48 = vsel %vm515_vm2, %v1572_v33, 0.0 }
 0xdcd   : > { %1577 = vadd.xlane.f32.xlu1 %v1576_v48 }
 0xe58   : > { %v1575_v18 = vpop.xlane.xlu0 %1574 }
 0xe59   : > { %v1579_v22 = vmul.f32 0.03125, %v1575_v18 }
 0xe5a   : > { %v1578_v23 = vpop.xlane.xlu1 %1577 }
 0xe5b   : > { %v1581_v50 = vadd.f32 1e-12, %v1579_v22  ;;  %v1580_v51 = vmul.f32 0.03125, %v1578_v23 }
 0xe5d   : > { %2348 = vrsqrt.f32 %v1581_v50  ;;  %v1582_v52 = vadd.f32 1e-12, %v1580_v51 }
 0xe5f   : > { %2350 = vrsqrt.f32 %v1582_v52 }
 0xe67   : > { %v2349_v53 = vpop.eup %2348 }
 0xe68   : > { %v1585_v56 = vmul.f32 %v2349_v53, %v1569_v43 }
 0xe69   : > { %v2351_v57 = vpop.eup %2350 }
 0xe6a   : > { %v1591_v58 = vmul.f32 %v2037_v55, %v1585_v56  ;;  %v1586_v59 = vmul.f32 %v2351_v57, %v1570_v45 }
 0xe6c   : > { %v1592_v60 = vmul.f32 %v2037_v55, %v1586_v59  ;;  %v1597_v61 = vadd.f32 %v2038_v44, %v1591_v58  ;;  %v2049_v59 = vld [vmem:[%s2514_s3 + $0x4] ss:$0 sm:$0xff] }
 0xe6e   : > { %v1598_v62 = vadd.f32 %v2038_v44, %v1592_v60 }
 0xe70   : > { %v1599_v63 = vpack.c.bf16 %v1598_v62, %v1597_v61 }
 0xe72   : > { %2231 = vmatmul.mubr.msk.bf16.vlgmr.msra.gmra.mrb[36].mxu0 %vm515_vm2, %v1599_v63 }
 0xf45   : > { %v1658_v5 = vpop.f32.mrb[36].mxu0 }
 0xf46   : > { %v1659_v6 = vadd.f32 %v2039_v4, %v1658_v5  ;;  %v2232_v7 = vpop.f32.mrb[37].mxu0  ;;  %v2361_v5 = vld [vmem:[%s2797_s9 + $0x8] sm:$0xff] (!%p2051_p5)  }
 0xf47   : > { %v1661_v8 = vpop.f32.mrb[38].mxu0 }
 0xf48   : > { %v1665_v9 = vmul.f32 %v1659_v6, %v1659_v6  ;;  %v1662_v10 = vadd.f32 %v2039_v4, %v1661_v8  ;;  %v2233_v11 = vpop.f32.mrb[39].mxu0  ;;  %v2416_v4 = vmov (!%p2051_p5), 0.0  }
 0xf49   : > { %2246 = vmatprep.subr.bf16.mxu0 (!%p2051_p5), %v2416_v4  ;;  %2250 = vmatprep.mubr.msk.bf16.mxu0 (!%p2051_p5), %vm2417_vm8, %v2416_v4  ;;  %v1824_v11 = vld [vmem:[%s2797_s9 + $0x10] sm:$0x1] (!%p2051_p5) }
 0xf4a   : > { %v1667_v12 = vmul.f32 %v1665_v9, %v1659_v6  ;;  %v1666_v13 = vmul.f32 %v1662_v10, %v1662_v10  ;;  %2247 = vmatpush3.bf16.msra.mxu0 (!%p2051_p5), %v2360_v3  ;;  %v1826_v9 = vlaneseq (!%p2051_p5) }
 0xf4b   : > { %2248 = vmatprep.subr.bf16.mxu0 (!%p2051_p5), %v2416_v4 }
 0xf4c   : > { %v1669_v14 = vmul.f32 0.044715, %v1667_v12  ;;  %v1668_v15 = vmul.f32 %v1666_v13, %v1662_v10  ;;  %v1825_v12 = vunpack.c.l.bf16 (!%p2051_p5), %v1824_v11 }
 0xf4e   : > { %v1671_v16 = vadd.f32 %v1669_v14, %v1659_v6  ;;  %v1670_v17 = vmul.f32 0.044715, %v1668_v15  ;;  %2249 = vmatpush3.bf16.msra.mxu0 (!%p2051_p5), %v2361_v5 }
 0xf50   : > { %v1673_v19 = vmul.f32 0.7978846, %v1671_v16  ;;  %v1672_v20 = vadd.f32 %v1670_v17, %v1662_v10 }
 0xf52   : > { %2352 = vtanh.f32 %v1673_v19  ;;  %v1674_v31 = vmul.f32 0.7978846, %v1672_v20 }
 0xf54   : > { %2354 = vtanh.f32 %v1674_v31 }
 0xf5c   : > { %v2353_v21 = vpop.eup %2352 }
 0xf5d   : > { %v1677_v24 = vadd.f32 1.0, %v2353_v21 }
 0xf5e   : > { %v2355_v25 = vpop.eup %2354 }
 0xf5f   : > { %v1679_v26 = vmul.f32 0.5, %v1677_v24  ;;  %v1678_v28 = vadd.f32 1.0, %v2355_v25 }
 0xf61   : > { %v1680_v29 = vmul.f32 0.5, %v1678_v28  ;;  %v1681_v30 = vmul.f32 %v1679_v26, %v1659_v6 }
 0xf63   : > { %v1682_v32 = vmul.f32 %v1680_v29, %v1662_v10  ;;  %v1827_v10 = vshrl.u32 (!%p2051_p5), %v1826_v9, 7 }
 0xf65   : > { %v1683_v35 = vpack.c.bf16 %v1682_v32, %v1681_v30  ;;  %v1828_v13 = vsub.s32 (!%p2051_p5), 0, %v1827_v10 }
 0xf67   : > { %2243 = vmatmul.mubr.msk.bf16.vlgmr.msra.gmra.mrb[36].mxu1 %vm1721_vm7, %v1683_v35  ;;  %v1829_v14 = vrot.slane (!%p2051_p5), %v1825_v12, %v1828_v13 }
0x103a   : > { %v1759_v27 = vpop.f32.mrb[36].mxu1 }
0x103b   : > { %v1760_v37 = vadd.f32 %v2043_v36, %v1759_v27  ;;  %v2244_v38 = vpop.f32.mrb[37].mxu1 }
0x103c   : > { %v1762_v39 = vpop.f32.mrb[38].mxu1 }
0x103d   : > { %v1763_v40 = vadd.f32 %v2043_v36, %v1762_v39  ;;  %v2245_v49 = vpop.f32.mrb[39].mxu1  ;;  %v1766_v42 = vadd.f32 %v1760_v37, %v1597_v61  ;;  %v2050_v61 = vld [vmem:[%s2514_s3 + $0x5] ss:$0 sm:$0xff] }
0x103f   : > { %v1770_v43 = vsel %vm515_vm2, %v1766_v42, 0.0  ;;  %v1767_v54 = vadd.f32 %v1763_v40, %v1598_v62 }
0x1040   : > { %1771 = vadd.xlane.f32.xlu0 %v1770_v43 }
0x1041   : > { %v1773_v45 = vsel %vm515_vm2, %v1767_v54, 0.0 }
0x1042   : > { %1774 = vadd.xlane.f32.xlu1 %v1773_v45 }
0x10cd   : > { %v1772_v46 = vpop.xlane.xlu0 %1771 }
0x10ce   : > { %v1776_v47 = vmul.f32 0.03125, %v1772_v46 }
0x10cf   : > { %v1775_v33 = vpop.xlane.xlu1 %1774 }
0x10d0   : > { %v1778_v48 = vsub.f32 %v1766_v42, %v1776_v47  ;;  %v1777_v34 = vmul.f32 0.03125, %v1775_v33 }
0x10d2   : > { %v1779_v41 = vsub.f32 %v1767_v54, %v1777_v34  ;;  %v1780_v18 = vmul.f32 %v1778_v48, %v1778_v48 }
0x10d4   : > { %v1782_v22 = vsel %vm515_vm2, %v1780_v18, 0.0  ;;  %v1781_v23 = vmul.f32 %v1779_v41, %v1779_v41 }
0x10d5   : > { %1783 = vadd.xlane.f32.xlu0 %v1782_v22 }
0x10d6   : > { %v1785_v50 = vsel %vm515_vm2, %v1781_v23, 0.0 }
0x10d7   : > { %1786 = vadd.xlane.f32.xlu1 %v1785_v50 }
0x1162   : > { %v1784_v51 = vpop.xlane.xlu0 %1783 }
0x1163   : > { %v1788_v52 = vmul.f32 0.03125, %v1784_v51 }
0x1164   : > { %v1787_v53 = vpop.xlane.xlu1 %1786 }
0x1165   : > { %v1790_v55 = vadd.f32 1e-12, %v1788_v52  ;;  %v1789_v56 = vmul.f32 0.03125, %v1787_v53 }
0x1167   : > { %2356 = vrsqrt.f32 %v1790_v55  ;;  %v1791_v57 = vadd.f32 1e-12, %v1789_v56 }
0x1169   : > { %2358 = vrsqrt.f32 %v1791_v57 }
0x1171   : > { %v2357_v58 = vpop.eup %2356 }
0x1172   : > { %v1794_v44 = vmul.f32 %v2357_v58, %v1778_v48 }
0x1173   : > { %v2359_v60 = vpop.eup %2358 }
0x1174   : > { %v1800_v62 = vmul.f32 %v2049_v59, %v1794_v44  ;;  %v1795_v63 = vmul.f32 %v2359_v60, %v1779_v41  ;;  %1813 = sbr.rel (%p2051_p5) target bundleno = 4694 (0x1256), region = 68 }
0x1176   : > { %v1806_v0 = vadd.f32 %v2050_v61, %v1800_v62  ;;  %v1801_v1 = vmul.f32 %v2049_v59, %v1795_v63 }
0x1178   : > { %1808 = vst.msk [vmem:[#allocation2] sm:$0xff] %vm515_vm2, %v1806_v0  ;;  %v1807_v2 = vadd.f32 %v2050_v61, %v1801_v1 }
0x117a   : > { %1809 = vst.msk [vmem:[#allocation2 + $0x8] sm:$0xff] %vm515_vm2, %v1807_v2  ;;  %v1815_v6 = vrot.slane (!%p2051_p5), %v1807_v2, 7 }
0x117c   : > { %v1818_v7 = vsel %vm1817_vm9, %v1806_v0, %v1815_v6 }
0x117d   : > { %v1819_v8 = vpack.c.bf16 %v1818_v7, %v1818_v7 }
0x117f   : > { %2251 = vmatmul.mubr.msk.bf16.vlgmr.msra.gmra.mrb[0].mxu0 %vm515_vm2, %v1819_v8 }
0x1252   : > { %v1879_v15 = vpop.f32.mrb[0].mxu0 }
0x1253   : > { %v1880_v16 = vadd.f32 %v1879_v15, %v1829_v14  ;;  %v2252_v17 = vpop.f32.mrb[1].mxu0 }
0x1254   : > { %v1882_v19 = vpop.f32.mrb[2].mxu0 }
0x1255   : > { %1885 = vst [vmem:[#allocation3] sm:$0x3] %v1880_v16  ;;  %v2253_v20 = vpop.f32.mrb[3].mxu0 }
0x1256 PF: > { %p2258_p6 = scmp.eq.s32.totalorder %s2480_s14, 1  ;;  %s2418_s22 = smov [#allocation3]  }
0x1257   : > { %s1893_s16 = sshll.u32 %s2418_s22, 4  ;;  %s1894_s16 = int_to_ptr.vmem [resolvable:$true] %s1893_s16 }
0x1258   : > { %s2362_s24 = scalar_lea.vmem %s1894_s16, 32  ;;  %p2369_p10 = scmp.lt.s32.totalorder %s1894_s16, %s1894_s16 }
0x1259   : > { %p2363_p7 = scmp.ne.s32.totalorder %s1894_s16, %s2362_s24  ;;  %p2370_p11 = scmp.lt.s32.totalorder %s2362_s24, %s2362_s24 }
0x125b   : > { %p2364_p8 = pnand %p2363_p7, %p2258_p6  ;;  %p2371_p12 = por %p2370_p11, %p2369_p10 }
0x125d   : > { %p2365_p9 = pneg %p2364_p8 }
0x125f   : > { %p2372_p13 = pnand %p2371_p12, %p2365_p9 }
0x1261   : > { %2375 = shalt.err (!%p2372_p13)
}
0x1262   : > { %s2376_s25 = scalar_lea.hbm %s2798_s10, 32 }
0x1263   : > { %p2377_p0 = scmp.ne.s32.totalorder %s2798_s10, %s2376_s25  ;;  %p2382_p3 = scmp.lt.u32.totalorder %s2376_s25, %s2798_s10 }
0x1265   : > { %p2378_p1 = pnand %p2377_p0, %p2258_p6 }
0x1267   : > { %p2379_p2 = pneg %p2378_p1 }
0x1269   : > { %p2384_p4 = pnand %p2382_p3, %p2379_p2 }
0x126b   : > { %2387 = shalt.err (!%p2384_p4)
}
0x126c   : > { %2255 = dma.vmem_to_hbm [thread:$0]  (%p2258_p6), %s1894_s16, 32, %s2798_s10, [#allocation4]  }
0x126d   : > { %2393 = dma.done.wait (%p2258_p6), [#allocation4], 32  }
0x126e   : > { %2395 = vsyncadd (%p2258_p6), [#allocation4], 4294967264 }
0x126f PF: > { %s21_s13 = sadd.s32 1, %s2398_s13  }
0x1270   : > { %p18_p5 = scmp.ge.s32.totalorder %s21_s13, 4  }
0x1272   :  { %20 = sbr.rel (!%p18_p5) target bundleno = 3 (0x3), region = 110 }
0x1279   :  { %1906 = vsyncpa [#allocation4], 1 }
0x127a   :  { %1908 = vsyncpa [#allocation4 + $0x1], 1 }

</bundles_post_ra>
